<compile_context>
chip_gen: v7x
topology: tpu7x:2x2x1
jax: 0.10.0
libtpu: 0.0.40
codegen_flags: <defaults>
</compile_context>

<pallas_src>
import jax
import jax.numpy as jnp
from jax.experimental import pallas as pl
from jax.experimental.pallas import tpu as pltpu

IN_FEATS = 28 * 28          # 784
HIDDEN = 512
OUT_FEATS = 10
OUT_PAD = 128               # lane-dense output width


def _round_up(x, m):
    return ((x + m - 1) // m) * m


def mlp_kernel(x_ref, w1_ref, b1_ref, w2_ref, b2_ref, w3_ref, b3_ref, o_ref):
    # x_ref: (TILE_B, 784) fp32; w*: bf16; b*: fp32; o_ref: (TILE_B, 128) fp32.
    x = x_ref[...].astype(jnp.bfloat16)   # cast in-kernel: no separate HBM pre-pass
    h1 = jnp.dot(x, w1_ref[...], preferred_element_type=jnp.float32) + b1_ref[...]
    h1 = jnp.maximum(h1, 0.0).astype(jnp.bfloat16)
    h2 = jnp.dot(h1, w2_ref[...], preferred_element_type=jnp.float32) + b2_ref[...]
    h2 = jnp.maximum(h2, 0.0).astype(jnp.bfloat16)
    y = jnp.dot(h2, w3_ref[...], preferred_element_type=jnp.float32) + b3_ref[...]
    o_ref[...] = y.astype(o_ref.dtype)


def init_params(key):
    # Deterministic init mimicking torch.nn.Linear default:
    # U(-1/sqrt(fan_in), 1/sqrt(fan_in)) for both weight and bias.
    # Weights stored transposed vs torch, i.e. (in_features, out_features).
    def linear(key, fan_in, fan_out):
        kw, kb = jax.random.split(key)
        bound = 1.0 / jnp.sqrt(jnp.float32(fan_in))
        w = jax.random.uniform(kw, (fan_in, fan_out), jnp.float32, -bound, bound)
        b = jax.random.uniform(kb, (1, fan_out), jnp.float32, -bound, bound)
        return w, b

    k1, k2, k3 = jax.random.split(key, 3)
    w1, b1 = linear(k1, IN_FEATS, HIDDEN)
    w2, b2 = linear(k2, HIDDEN, HIDDEN)
    w3, b3 = linear(k3, HIDDEN, OUT_FEATS)
    return (w1, b1, w2, b2, w3, b3)


def prepare_params(params):
    """One-time conversion: cast weights to bf16, pad the output layer to 128 lanes."""
    w1, b1, w2, b2, w3, b3 = params
    w1p = w1.astype(jnp.bfloat16)                                               # (784, 512)
    w2p = w2.astype(jnp.bfloat16)                                               # (512, 512)
    w3p = jnp.pad(w3, ((0, 0), (0, OUT_PAD - OUT_FEATS))).astype(jnp.bfloat16)  # (512, 128)
    b3p = jnp.pad(b3, ((0, 0), (0, OUT_PAD - OUT_FEATS)))                       # (1, 128) fp32
    return (w1p, b1, w2p, b2, w3p, b3p)


def mnist_forward(x_nchw, prepped_params):
    w1, b1, w2, b2, w3, b3 = prepped_params
    B = x_nchw.shape[0]

    # Flatten like torch x.view(x.size(0), -1). Pure reshape, no copy, no dtype change.
    x = x_nchw.reshape(B, -1)

    # Batch tile: 128..512, chosen so the grid has >=2 steps whenever B > 128
    # (keeps both TensorCores busy on v7x while amortizing per-step overhead).
    tile_b = min(512, max(128, _round_up(pl.cdiv(B, 2), 128)))
    b_pad = _round_up(B, tile_b)
    if b_pad != B:
        # Only small / misaligned batches pay this pad; aligned batches go straight in.
        x = jnp.pad(x, ((0, b_pad - B), (0, 0)))

    grid = (b_pad // tile_b,)

    flops = 2 * b_pad * (IN_FEATS * HIDDEN + HIDDEN * HIDDEN + HIDDEN * OUT_PAD)
    bytes_accessed = (
        b_pad * IN_FEATS * 4                                   # x (fp32 in)
        + (w1.size + w2.size + w3.size) * 2                    # bf16 weights
        + (b1.size + b2.size + b3.size) * 4                    # fp32 biases
        + b_pad * OUT_PAD * 4                                  # fp32 logits out
    )

    out = pl.pallas_call(
        mlp_kernel,
        out_shape=jax.ShapeDtypeStruct((b_pad, OUT_PAD), jnp.float32),
        grid=grid,
        in_specs=[
            pl.BlockSpec((tile_b, IN_FEATS), lambda i: (i, 0)),    # x, blocked on batch
            pl.BlockSpec((IN_FEATS, HIDDEN), lambda i: (0, 0)),    # w1, VMEM-resident
            pl.BlockSpec((1, HIDDEN), lambda i: (0, 0)),           # b1
            pl.BlockSpec((HIDDEN, HIDDEN), lambda i: (0, 0)),      # w2
            pl.BlockSpec((1, HIDDEN), lambda i: (0, 0)),           # b2
            pl.BlockSpec((HIDDEN, OUT_PAD), lambda i: (0, 0)),     # w3 (padded to 128)
            pl.BlockSpec((1, OUT_PAD), lambda i: (0, 0)),          # b3 (padded to 128)
        ],
        out_specs=pl.BlockSpec((tile_b, OUT_PAD), lambda i: (i, 0)),
        compiler_params=pltpu.CompilerParams(
            dimension_semantics=("parallel",),
        ),
        cost_estimate=pl.CostEstimate(
            flops=flops, transcendentals=0, bytes_accessed=bytes_accessed,
        ),
    )(x, w1, b1, w2, b2, w3, b3)

    return out[:B, :OUT_FEATS]


def reference_forward_bf16(x_nchw, params):
    """Reference matching the kernel's bf16 quantization (fp32 accumulation)."""
    w1, b1, w2, b2, w3, b3 = params
    x = x_nchw.reshape(x_nchw.shape[0], -1).astype(jnp.bfloat16)
    f32 = jnp.float32
    h = x.astype(f32) @ w1.astype(jnp.bfloat16).astype(f32) + b1
    h = jax.nn.relu(h).astype(jnp.bfloat16)
    h = h.astype(f32) @ w2.astype(jnp.bfloat16).astype(f32) + b2
    h = jax.nn.relu(h).astype(jnp.bfloat16)
    y = h.astype(f32) @ w3.astype(jnp.bfloat16).astype(f32) + b3
    return y


if __name__ == "__main__":
    key = jax.random.PRNGKey(0)
    kx, kp = jax.random.split(key)

    B = 8
    x = jax.random.normal(kx, (B, 1, 28, 28), jnp.float32)  # NCHW like PyTorch
    params = init_params(kp)
    prepped = prepare_params(params)

    y = mnist_forward(x, prepped)
    y = jax.block_until_ready(y)

    y_ref = reference_forward_bf16(x, params)
    assert y.shape == (B, OUT_FEATS)
    assert jnp.allclose(y, y_ref, atol=2e-3, rtol=2e-3), (
        float(jnp.max(jnp.abs(y - y_ref)))
    )

    print("KERNEL_OK")
</pallas_src>

<mosaic_0001>
module attributes {stable_mosaic.version = 11 : i64} {
  func.func @mlp_kernel(%arg0: i32, %arg1: memref<128x784xf32, #tpu.memory_space<vmem>>, %arg2: memref<784x512xbf16, #tpu.memory_space<vmem>>, %arg3: memref<1x512xf32, #tpu.memory_space<vmem>>, %arg4: memref<512x512xbf16, #tpu.memory_space<vmem>>, %arg5: memref<1x512xf32, #tpu.memory_space<vmem>>, %arg6: memref<512x128xbf16, #tpu.memory_space<vmem>>, %arg7: memref<1x128xf32, #tpu.memory_space<vmem>>, %arg8: memref<128x128xf32, #tpu.memory_space<vmem>>) attributes {dimension_semantics = [#tpu.dimension_semantics<parallel>], iteration_bounds = array<i64: 1>, scalar_prefetch = 0 : i64, scratch_operands = 0 : i64, tpu.core_type = #tpu.core_type<tc>, window_params = [{transform_indices = @transform_0, window_bounds = array<i64: 128, 784>}, {pipeline_mode = #tpu.pipeline_mode<synchronous>, transform_indices = @transform_1, window_bounds = array<i64: 784, 512>}, {pipeline_mode = #tpu.pipeline_mode<synchronous>, transform_indices = @transform_2, window_bounds = array<i64: 1, 512>}, {pipeline_mode = #tpu.pipeline_mode<synchronous>, transform_indices = @transform_3, window_bounds = array<i64: 512, 512>}, {pipeline_mode = #tpu.pipeline_mode<synchronous>, transform_indices = @transform_4, window_bounds = array<i64: 1, 512>}, {pipeline_mode = #tpu.pipeline_mode<synchronous>, transform_indices = @transform_5, window_bounds = array<i64: 512, 128>}, {pipeline_mode = #tpu.pipeline_mode<synchronous>, transform_indices = @transform_6, window_bounds = array<i64: 1, 128>}, {transform_indices = @transform_7, window_bounds = array<i64: 128, 128>}]} {
    %c0 = arith.constant 0 : index
    %c0_0 = arith.constant 0 : index
    %0 = vector.load %arg1[%c0, %c0_0] : memref<128x784xf32, #tpu.memory_space<vmem>>, vector<128x784xf32>
    %1 = arith.truncf %0 : vector<128x784xf32> to vector<128x784xbf16>
    %c0_1 = arith.constant 0 : index
    %c0_2 = arith.constant 0 : index
    %2 = vector.load %arg2[%c0_1, %c0_2] : memref<784x512xbf16, #tpu.memory_space<vmem>>, vector<784x512xbf16>
    %cst = arith.constant dense<0.000000e+00> : vector<128x512xf32>
    %3 = tpu.matmul %1, %2, %cst {dimension_numbers = #tpu.dot_dimension_numbers<[1], [0], [0], [1], [0, 0, 1, 1], [], []>} : vector<128x784xbf16>, vector<784x512xbf16>, vector<128x512xf32> -> vector<128x512xf32>
    %c0_3 = arith.constant 0 : index
    %c0_4 = arith.constant 0 : index
    %4 = vector.load %arg3[%c0_3, %c0_4] : memref<1x512xf32, #tpu.memory_space<vmem>>, vector<1x512xf32>
    %5 = vector.broadcast %4 : vector<1x512xf32> to vector<128x512xf32>
    %6 = arith.addf %3, %5 : vector<128x512xf32>
    %cst_5 = arith.constant 0.000000e+00 : f32
    %7 = vector.broadcast %cst_5 : f32 to vector<128x512xf32>
    %8 = arith.maximumf %6, %7 : vector<128x512xf32>
    %9 = arith.truncf %8 : vector<128x512xf32> to vector<128x512xbf16>
    %c0_6 = arith.constant 0 : index
    %c0_7 = arith.constant 0 : index
    %10 = vector.load %arg4[%c0_6, %c0_7] : memref<512x512xbf16, #tpu.memory_space<vmem>>, vector<512x512xbf16>
    %cst_8 = arith.constant dense<0.000000e+00> : vector<128x512xf32>
    %11 = tpu.matmul %9, %10, %cst_8 {dimension_numbers = #tpu.dot_dimension_numbers<[1], [0], [0], [1], [0, 0, 1, 1], [], []>} : vector<128x512xbf16>, vector<512x512xbf16>, vector<128x512xf32> -> vector<128x512xf32>
    %c0_9 = arith.constant 0 : index
    %c0_10 = arith.constant 0 : index
    %12 = vector.load %arg5[%c0_9, %c0_10] : memref<1x512xf32, #tpu.memory_space<vmem>>, vector<1x512xf32>
    %13 = vector.broadcast %12 : vector<1x512xf32> to vector<128x512xf32>
    %14 = arith.addf %11, %13 : vector<128x512xf32>
    %cst_11 = arith.constant 0.000000e+00 : f32
    %15 = vector.broadcast %cst_11 : f32 to vector<128x512xf32>
    %16 = arith.maximumf %14, %15 : vector<128x512xf32>
    %17 = arith.truncf %16 : vector<128x512xf32> to vector<128x512xbf16>
    %c0_12 = arith.constant 0 : index
    %c0_13 = arith.constant 0 : index
    %18 = vector.load %arg6[%c0_12, %c0_13] : memref<512x128xbf16, #tpu.memory_space<vmem>>, vector<512x128xbf16>
    %cst_14 = arith.constant dense<0.000000e+00> : vector<128x128xf32>
    %19 = tpu.matmul %17, %18, %cst_14 {dimension_numbers = #tpu.dot_dimension_numbers<[1], [0], [0], [1], [0, 0, 1, 1], [], []>} : vector<128x512xbf16>, vector<512x128xbf16>, vector<128x128xf32> -> vector<128x128xf32>
    %c0_15 = arith.constant 0 : index
    %c0_16 = arith.constant 0 : index
    %20 = vector.load %arg7[%c0_15, %c0_16] : memref<1x128xf32, #tpu.memory_space<vmem>>, vector<1x128xf32>
    %21 = vector.broadcast %20 : vector<1x128xf32> to vector<128x128xf32>
    %22 = arith.addf %19, %21 : vector<128x128xf32>
    %c0_17 = arith.constant 0 : index
    %c0_18 = arith.constant 0 : index
    %23 = vector.load %arg8[%c0_17, %c0_18] : memref<128x128xf32, #tpu.memory_space<vmem>>, vector<128x128xf32>
    tpu.vector_store %arg8[%c0_17, %c0_18], %22 {strides = array<i32>} : memref<128x128xf32, #tpu.memory_space<vmem>>, vector<128x128xf32>,
    return
  }
  func.func @transform_0(%arg0: i32) -> (i32, i32) {
    %c0_i32 = arith.constant 0 : i32
    %c0_i32_0 = arith.constant 0 : i32
    return %arg0, %c0_i32 : i32, i32
  }
  func.func @transform_1(%arg0: i32) -> (i32, i32) {
    %c0_i32 = arith.constant 0 : i32
    %c0_i32_0 = arith.constant 0 : i32
    %c0_i32_1 = arith.constant 0 : i32
    return %c0_i32, %c0_i32_0 : i32, i32
  }
  func.func @transform_2(%arg0: i32) -> (i32, i32) {
    %c0_i32 = arith.constant 0 : i32
    %c0_i32_0 = arith.constant 0 : i32
    %c0_i32_1 = arith.constant 0 : i32
    return %c0_i32, %c0_i32_0 : i32, i32
  }
  func.func @transform_3(%arg0: i32) -> (i32, i32) {
    %c0_i32 = arith.constant 0 : i32
    %c0_i32_0 = arith.constant 0 : i32
    %c0_i32_1 = arith.constant 0 : i32
    return %c0_i32, %c0_i32_0 : i32, i32
  }
  func.func @transform_4(%arg0: i32) -> (i32, i32) {
    %c0_i32 = arith.constant 0 : i32
    %c0_i32_0 = arith.constant 0 : i32
    %c0_i32_1 = arith.constant 0 : i32
    return %c0_i32, %c0_i32_0 : i32, i32
  }
  func.func @transform_5(%arg0: i32) -> (i32, i32) {
    %c0_i32 = arith.constant 0 : i32
    %c0_i32_0 = arith.constant 0 : i32
    %c0_i32_1 = arith.constant 0 : i32
    return %c0_i32, %c0_i32_0 : i32, i32
  }
  func.func @transform_6(%arg0: i32) -> (i32, i32) {
    %c0_i32 = arith.constant 0 : i32
    %c0_i32_0 = arith.constant 0 : i32
    %c0_i32_1 = arith.constant 0 : i32
    return %c0_i32, %c0_i32_0 : i32, i32
  }
  func.func @transform_7(%arg0: i32) -> (i32, i32) {
    %c0_i32 = arith.constant 0 : i32
    %c0_i32_0 = arith.constant 0 : i32
    return %arg0, %c0_i32 : i32, i32
  }
}

</mosaic_0001>

<bundles_post_ra>
// kernel: tpu_custom_call.1
= control target key start
LH: loop header
LB: loop body
LE: loop exit
PB: predicated region body
PF: predicated region fallthrough
CT: control target
= control target key end

     0   :  { %12 = vsyncpa [#allocation3], 0  ;;  %s7060_s0 = inlined_call_operand.vmem [shape: f32[128,784], index: 0, kind: input, shape index: {}]   ;;  %s7061_s1 = inlined_call_operand.vmem [shape: bf16[784,512], index: 1, kind: input, shape index: {}]   ;;  %s7062_s2 = inlined_call_operand.vmem [shape: f32[1,512], index: 2, kind: input, shape index: {}]   ;;  %s7063_s3 = inlined_call_operand.hbm [shape: bf16[512,512], index: 3, kind: input, shape index: {}]   ;;  %s7064_s4 = inlined_call_operand.vmem [shape: f32[1,512], index: 4, kind: input, shape index: {}]   ;;  %s7065_s5 = inlined_call_operand.hbm [shape: bf16[512,128], index: 5, kind: input, shape index: {}]   ;;  %s7066_s6 = inlined_call_operand.vmem [shape: f32[1,128], index: 6, kind: input, shape index: {}]   ;;  %s7067_s7 = inlined_call_operand.hbm [shape: f32[128,128], index: 7, kind: output, shape index: {}]  }
   0x1   :  { %13 = vsyncpa [#allocation6], 0 }
   0x2   :  { %14 = vsyncpa [#allocation4], 0  ;;  %s5761_s24 = smov [#allocation2]   ;;  %s5689_s28 = scalar_lea.hbm %s7063_s3, 16384 }
   0x3   :  { %s26_s25 = sshll.u32 %s5761_s24, 4  ;;  %p5690_p0 = scmp.ne.s32.totalorder %s7063_s3, %s5689_s28  ;;  %s27_s25 = int_to_ptr.vmem [resolvable:$true] %s26_s25 }
   0x4   :  { %p5693_p1 = scmp.lt.u32.totalorder %s5689_s28, %s7063_s3 }
   0x6   :  { %p5695_p2 = pnand %p5693_p1, %p5690_p0 }
   0x8   :  { %5698 = shalt.err (!%p5695_p2)
}
   0x9   :  { %s5699_s10 = scalar_lea.vmem %s27_s25, 16384  ;;  %p5704_p4 = scmp.lt.s32.totalorder %s27_s25, %s27_s25 }
   0xa   :  { %p5700_p3 = scmp.ne.s32.totalorder %s27_s25, %s5699_s10  ;;  %p5705_p5 = scmp.lt.s32.totalorder %s5699_s10, %s5699_s10 }
   0xc   :  { %p5706_p6 = por %p5705_p5, %p5704_p4 }
   0xe   :  { %p5707_p7 = pnand %p5706_p6, %p5700_p3 }
  0x10   :  { %5710 = shalt.err (!%p5707_p7)
}
  0x11   :  { %s5762_s11 = smov 256   ;;  %s5763_s12 = smov 16  }
  0x12   :  { %32 = dma.hbm_to_vmem [thread:$0]  %s7063_s3, 16384, %s27_s25, [#allocation3], %s5762_s11, %s5762_s11, %s5763_s12  }
  0x13   :  { %s5764_s15 = smov [#allocation5]   ;;  %s5711_s19 = scalar_lea.hbm %s7065_s5, 4096 }
  0x14   :  { %s40_s16 = sshll.u32 %s5764_s15, 4  ;;  %p5712_p8 = scmp.ne.s32.totalorder %s7065_s5, %s5711_s19  ;;  %s41_s16 = int_to_ptr.vmem [resolvable:$true] %s40_s16 }
  0x15   :  { %p5715_p9 = scmp.lt.u32.totalorder %s5711_s19, %s7065_s5 }
  0x17   :  { %p5717_p10 = pnand %p5715_p9, %p5712_p8 }
  0x19   :  { %5720 = shalt.err (!%p5717_p10)
}
  0x1a   :  { %s5721_s24 = scalar_lea.vmem %s41_s16, 4096  ;;  %p5726_p12 = scmp.lt.s32.totalorder %s41_s16, %s41_s16 }
  0x1b   :  { %p5722_p11 = scmp.ne.s32.totalorder %s41_s16, %s5721_s24  ;;  %p5727_p13 = scmp.lt.s32.totalorder %s5721_s24, %s5721_s24 }
  0x1d   :  { %p5728_p0 = por %p5727_p13, %p5726_p12 }
  0x1f   :  { %p5729_p1 = pnand %p5728_p0, %p5722_p11 }
  0x21   :  { %5732 = shalt.err (!%p5729_p1)
}
  0x22   :  { %s5765_s3 = smov 64   ;;  %s5766_s25 = smov 4  }
  0x23   :  { %46 = dma.hbm_to_vmem [thread:$0]  %s7065_s5, 4096, %s41_s16, [#allocation6], %s5765_s3, %s5765_s3, %s5766_s25  }
  0x24   :  { %5755 = dma.done.wait [#allocation3], 16384  }
  0x25   :  { %5756 = vsyncadd [#allocation3], 4294950912 }
  0x26   :  { %5757 = dma.done.wait [#allocation6], 4096  }
  0x27   :  { %5758 = vsyncadd [#allocation6], 4294963200  ;;  %v5171_v0 = vld [vmem:[%s7061_s1 + $0x4] ss:$16 sps:$4 sm:$0xff]   ;;  %v5173_v1 = vld [vmem:[%s7061_s1 + $0xc] ss:$16 sps:$4 sm:$0xff]  }
  0x28   :  { %1447 = vmatprep.subr.bf16.mxu0 %v5171_v0  ;;  %v5175_v2 = vld [vmem:[%s7061_s1] ss:$16 sps:$4 sm:$0xff]   ;;  %v5176_v3 = vld [vmem:[%s7061_s1 + $0x8] ss:$16 sps:$4 sm:$0xff]   ;;  %1899 = vmatprep.subr.bf16.mxu1 %v5173_v1  ;;  %v5177_v4 = vld [vmem:[%s7061_s1 + $0x24] ss:$16 sps:$4 sm:$0xff]  }
  0x29   :  { %1448 = vmatpush1.bf16.msra.mxu0 %v5175_v2  ;;  %1900 = vmatpush1.bf16.msra.mxu1 %v5176_v3  ;;  %v5179_v5 = vld [vmem:[%s7061_s1 + $0x2c] ss:$16 sps:$4 sm:$0xff]   ;;  %v5181_v6 = vld [vmem:[%s7061_s1 + $0x20] ss:$16 sps:$4 sm:$0xff]   ;;  %v5182_v7 = vld [vmem:[%s7061_s1 + $0x28] ss:$16 sps:$4 sm:$0xff]  }
  0x2a   :  { %1449 = vmatprep.subr.bf16.mxu0 %v5177_v4  ;;  %1901 = vmatprep.subr.bf16.mxu1 %v5179_v5  ;;  %v5183_v8 = vld [vmem:[%s7061_s1 + $0x44] ss:$16 sps:$4 sm:$0xff]   ;;  %v5185_v9 = vld [vmem:[%s7061_s1 + $0x4c] ss:$16 sps:$4 sm:$0xff]   ;;  %v5187_v10 = vld [vmem:[%s7061_s1 + $0x40] ss:$16 sps:$4 sm:$0xff]  }
  0x2b   :  { %v5188_v11 = vld [vmem:[%s7061_s1 + $0x48] ss:$16 sps:$4 sm:$0xff]   ;;  %v5189_v12 = vld [vmem:[%s7061_s1 + $0x64] ss:$16 sps:$4 sm:$0xff]   ;;  %v5191_v13 = vld [vmem:[%s7061_s1 + $0x6c] ss:$16 sps:$4 sm:$0xff]  }
  0x2c   :  { %v5193_v14 = vld [vmem:[%s7061_s1 + $0x60] ss:$16 sps:$4 sm:$0xff]   ;;  %v5194_v15 = vld [vmem:[%s7061_s1 + $0x68] ss:$16 sps:$4 sm:$0xff]   ;;  %v5195_v16 = vld [vmem:[%s7061_s1 + $0x84] ss:$16 sps:$4 sm:$0xff]  }
  0x2d   :  { %1450 = vmatpush1.bf16.msra.mxu0 %v5181_v6  ;;  %1902 = vmatpush1.bf16.msra.mxu1 %v5182_v7  ;;  %v5197_v17 = vld [vmem:[%s7061_s1 + $0x8c] ss:$16 sps:$4 sm:$0xff]   ;;  %v5199_v18 = vld [vmem:[%s7061_s1 + $0x80] ss:$16 sps:$4 sm:$0xff]   ;;  %v5200_v19 = vld [vmem:[%s7061_s1 + $0x88] ss:$16 sps:$4 sm:$0xff]  }
  0x2e   :  { %1451 = vmatprep.subr.bf16.mxu0 %v5183_v8  ;;  %1903 = vmatprep.subr.bf16.mxu1 %v5185_v9  ;;  %v5201_v20 = vld [vmem:[%s7061_s1 + $0xa4] ss:$16 sps:$4 sm:$0xff]   ;;  %v5203_v21 = vld [vmem:[%s7061_s1 + $0xac] ss:$16 sps:$4 sm:$0xff]   ;;  %v5205_v22 = vld [vmem:[%s7061_s1 + $0xa0] ss:$16 sps:$4 sm:$0xff]  }
  0x2f   :  { %v5206_v23 = vld [vmem:[%s7061_s1 + $0xa8] ss:$16 sps:$4 sm:$0xff]   ;;  %v5207_v24 = vld [vmem:[%s7061_s1 + $0xc4] ss:$16 sps:$4 sm:$0xff]   ;;  %v5209_v25 = vld [vmem:[%s7061_s1 + $0xcc] ss:$16 sps:$4 sm:$0xff]  }
  0x30   :  { %v5211_v26 = vld [vmem:[%s7061_s1 + $0xc0] ss:$16 sps:$4 sm:$0xff]   ;;  %v5212_v27 = vld [vmem:[%s7061_s1 + $0xc8] ss:$16 sps:$4 sm:$0xff]   ;;  %v5213_v28 = vld [vmem:[%s7061_s1 + $0xe4] ss:$16 sps:$4 sm:$0xff]  }
  0x31   :  { %1452 = vmatpush1.bf16.msra.mxu0 %v5187_v10  ;;  %1904 = vmatpush1.bf16.msra.mxu1 %v5188_v11  ;;  %v5215_v29 = vld [vmem:[%s7061_s1 + $0xec] ss:$16 sps:$4 sm:$0xff]   ;;  %v5217_v30 = vld [vmem:[%s7061_s1 + $0xe0] ss:$16 sps:$4 sm:$0xff]   ;;  %v5218_v31 = vld [vmem:[%s7061_s1 + $0xe8] ss:$16 sps:$4 sm:$0xff]  }
  0x32   :  { %1453 = vmatprep.subr.bf16.mxu0 %v5189_v12  ;;  %1905 = vmatprep.subr.bf16.mxu1 %v5191_v13  ;;  %v5219_v32 = vld [vmem:[%s7061_s1 + $0x104] ss:$16 sps:$4 sm:$0xff]   ;;  %v5221_v33 = vld [vmem:[%s7061_s1 + $0x10c] ss:$16 sps:$4 sm:$0xff]   ;;  %v5223_v34 = vld [vmem:[%s7061_s1 + $0x100] ss:$16 sps:$4 sm:$0xff]  }
  0x33   :  { %v5224_v35 = vld [vmem:[%s7061_s1 + $0x108] ss:$16 sps:$4 sm:$0xff]   ;;  %v5225_v36 = vld [vmem:[%s7061_s1 + $0x124] ss:$16 sps:$4 sm:$0xff]   ;;  %v5227_v37 = vld [vmem:[%s7061_s1 + $0x12c] ss:$16 sps:$4 sm:$0xff]  }
  0x34   :  { %v5229_v38 = vld [vmem:[%s7061_s1 + $0x120] ss:$16 sps:$4 sm:$0xff]   ;;  %v5230_v39 = vld [vmem:[%s7061_s1 + $0x128] ss:$16 sps:$4 sm:$0xff]   ;;  %v5231_v40 = vld [vmem:[%s7061_s1 + $0x144] ss:$16 sps:$4 sm:$0xff]  }
  0x35   :  { %1454 = vmatpush1.bf16.msra.mxu0 %v5193_v14  ;;  %1906 = vmatpush1.bf16.msra.mxu1 %v5194_v15  ;;  %v5233_v41 = vld [vmem:[%s7061_s1 + $0x14c] ss:$16 sps:$4 sm:$0xff]   ;;  %v5235_v42 = vld [vmem:[%s7061_s1 + $0x140] ss:$16 sps:$4 sm:$0xff]   ;;  %v5236_v43 = vld [vmem:[%s7061_s1 + $0x148] ss:$16 sps:$4 sm:$0xff]  }
  0x36   :  { %1455 = vmatprep.subr.bf16.mxu0 %v5195_v16  ;;  %1907 = vmatprep.subr.bf16.mxu1 %v5197_v17  ;;  %v5237_v44 = vld [vmem:[%s7061_s1 + $0x164] ss:$16 sps:$4 sm:$0xff]   ;;  %v5239_v45 = vld [vmem:[%s7061_s1 + $0x16c] ss:$16 sps:$4 sm:$0xff]   ;;  %v5241_v47 = vld [vmem:[%s7061_s1 + $0x160] ss:$16 sps:$4 sm:$0xff]  }
  0x37   :  { %v57_v46 = vld [vmem:[%s7060_s0 + $0x8] sm:$0xff]  ;;  %v64_v49 = vld [vmem:[%s7060_s0 + $0x40] sm:$0xff]  ;;  %v63_v4 = vld [vmem:[%s7060_s0 + $0x38] sm:$0xff]  ;;  %vm1422_vm0 = vcmask 130048  }
  0x38   :  { %v5242_v48 = vld [vmem:[%s7061_s1 + $0x168] ss:$16 sps:$4 sm:$0xff]   ;;  %v5243_v50 = vld [vmem:[%s7061_s1 + $0x184] ss:$16 sps:$4 sm:$0xff]   ;;  %v169_v51 = vpack.c.bf16 %v64_v49, %v57_v46  ;;  %v5245_v52 = vld [vmem:[%s7061_s1 + $0x18c] ss:$16 sps:$4 sm:$0xff]  }
  0x39   :  { %1456 = vmatpush1.bf16.msra.mxu0 %v5199_v18  ;;  %1908 = vmatpush1.bf16.msra.mxu1 %v5200_v19  ;;  %v5247_v53 = vld [vmem:[%s7061_s1 + $0x180] ss:$16 sps:$4 sm:$0xff]   ;;  %v5248_v54 = vld [vmem:[%s7061_s1 + $0x188] ss:$16 sps:$4 sm:$0xff]   ;;  %v5249_v55 = vld [vmem:[%s7061_s1 + $0x1a4] ss:$16 sps:$4 sm:$0xff]  }
  0x3a   :  { %1457 = vmatprep.subr.bf16.mxu0 %v5201_v20  ;;  %1909 = vmatprep.subr.bf16.mxu1 %v5203_v21  ;;  %v5251_v56 = vld [vmem:[%s7061_s1 + $0x1ac] ss:$16 sps:$4 sm:$0xff]   ;;  %v5253_v57 = vld [vmem:[%s7061_s1 + $0x1a0] ss:$16 sps:$4 sm:$0xff]   ;;  %v5254_v58 = vld [vmem:[%s7061_s1 + $0x1a8] ss:$16 sps:$4 sm:$0xff]  }
  0x3b   :  { %1479 = vmatprep.mubr.bf16.mxu0 %v169_v51  ;;  %1931 = vmatprep.mubr.bf16.mxu1 %v169_v51  ;;  %v5255_v59 = vld [vmem:[%s7061_s1 + $0x1c4] ss:$16 sps:$4 sm:$0xff]   ;;  %v5257_v60 = vld [vmem:[%s7061_s1 + $0x1cc] ss:$16 sps:$4 sm:$0xff]   ;;  %v5259_v61 = vld [vmem:[%s7061_s1 + $0x1c0] ss:$16 sps:$4 sm:$0xff]  }
  0x3c   :  { %v5260_v62 = vld [vmem:[%s7061_s1 + $0x1c8] ss:$16 sps:$4 sm:$0xff]   ;;  %v5261_v63 = vld [vmem:[%s7061_s1 + $0x1e4] ss:$16 sps:$4 sm:$0xff]   ;;  %v5263_v0 = vld [vmem:[%s7061_s1 + $0x1ec] ss:$16 sps:$4 sm:$0xff]  }
  0x3d   :  { %1458 = vmatpush1.bf16.msra.mxu0 %v5205_v22  ;;  %1910 = vmatpush1.bf16.msra.mxu1 %v5206_v23  ;;  %v5265_v1 = vld [vmem:[%s7061_s1 + $0x1e0] ss:$16 sps:$4 sm:$0xff]   ;;  %v5266_v2 = vld [vmem:[%s7061_s1 + $0x1e8] ss:$16 sps:$4 sm:$0xff]   ;;  %v5269_v5 = vld [vmem:[%s7061_s1 + $0x204] ss:$16 sps:$4 sm:$0xff]  }
  0x3e   :  { %1459 = vmatprep.subr.bf16.mxu0 %v5207_v24  ;;  %1911 = vmatprep.subr.bf16.mxu1 %v5209_v25  ;;  %v56_v3 = vld [vmem:[%s7060_s0] sm:$0xff]  ;;  %v5272_v6 = vld [vmem:[%s7061_s1 + $0x20c] ss:$16 sps:$4 sm:$0xff]   ;;  %v5270_v9 = vld [vmem:[%s7061_s1 + $0x208] ss:$16 sps:$4 sm:$0xff]  }
  0x3f   :  { %v5267_v7 = vld [vmem:[%s7061_s1 + $0x200] ss:$16 sps:$4 sm:$0xff]   ;;  %v168_v8 = vpack.c.bf16 %v63_v4, %v56_v3  ;;  %v71_v10 = vld [vmem:[%s7060_s0 + $0x78] sm:$0xff]  ;;  %v5275_v12 = vld [vmem:[%s7061_s1 + $0x224] ss:$16 sps:$4 sm:$0xff]  }
  0x40   :  { %v78_v11 = vld [vmem:[%s7060_s0 + $0xb0] sm:$0xff]  ;;  %v5278_v13 = vld [vmem:[%s7061_s1 + $0x22c] ss:$16 sps:$4 sm:$0xff]   ;;  %v5276_v16 = vld [vmem:[%s7061_s1 + $0x228] ss:$16 sps:$4 sm:$0xff]  }
  0x41   :  { %1460 = vmatpush1.bf16.msra.mxu0 %v5211_v26  ;;  %1912 = vmatpush1.bf16.msra.mxu1 %v5212_v27  ;;  %v5273_v14 = vld [vmem:[%s7061_s1 + $0x220] ss:$16 sps:$4 sm:$0xff]   ;;  %v176_v15 = vpack.c.bf16 %v78_v11, %v71_v10  ;;  %v77_v18 = vld [vmem:[%s7060_s0 + $0xa8] sm:$0xff]  ;;  %v5281_v19 = vld [vmem:[%s7061_s1 + $0x244] ss:$16 sps:$4 sm:$0xff]  }
  0x42   :  { %1461 = vmatprep.subr.bf16.mxu0 %v5213_v28  ;;  %1913 = vmatprep.subr.bf16.mxu1 %v5215_v29  ;;  %v70_v17 = vld [vmem:[%s7060_s0 + $0x70] sm:$0xff]  ;;  %v5284_v20 = vld [vmem:[%s7061_s1 + $0x24c] ss:$16 sps:$4 sm:$0xff]   ;;  %v5282_v22 = vld [vmem:[%s7061_s1 + $0x248] ss:$16 sps:$4 sm:$0xff]  }
  0x43   :  { %v5279_v21 = vld [vmem:[%s7061_s1 + $0x240] ss:$16 sps:$4 sm:$0xff]   ;;  %v175_v23 = vpack.c.bf16 %v77_v18, %v70_v17  ;;  %v85_v24 = vld [vmem:[%s7060_s0 + $0xe8] sm:$0xff]  ;;  %v5287_v26 = vld [vmem:[%s7061_s1 + $0x264] ss:$16 sps:$4 sm:$0xff]  }
  0x44   :  { %v92_v25 = vld [vmem:[%s7060_s0 + $0x120] sm:$0xff]  ;;  %v5290_v27 = vld [vmem:[%s7061_s1 + $0x26c] ss:$16 sps:$4 sm:$0xff]   ;;  %v5318_v3 = vld [vmem:[%s7061_s1 + $0x308] ss:$16 sps:$4 sm:$0xff]  }
  0x45   :  { %1462 = vmatpush1.bf16.msra.mxu0 %v5217_v30  ;;  %1914 = vmatpush1.bf16.msra.mxu1 %v5218_v31  ;;  %v183_v28 = vpack.c.bf16 %v92_v25, %v85_v24  ;;  %v5285_v29 = vld [vmem:[%s7061_s1 + $0x260] ss:$16 sps:$4 sm:$0xff]   ;;  %v5288_v30 = vld [vmem:[%s7061_s1 + $0x268] ss:$16 sps:$4 sm:$0xff]   ;;  %v5323_v4 = vld [vmem:[%s7061_s1 + $0x324] ss:$16 sps:$4 sm:$0xff]  }
  0x46   :  { %1463 = vmatprep.subr.bf16.mxu0 %v5219_v32  ;;  %1915 = vmatprep.subr.bf16.mxu1 %v5221_v33  ;;  %v84_v31 = vld [vmem:[%s7060_s0 + $0xe0] sm:$0xff]  ;;  %v91_v32 = vld [vmem:[%s7060_s0 + $0x118] sm:$0xff]  ;;  %v105_v46 = vld [vmem:[%s7060_s0 + $0x188] sm:$0xff] }
  0x47   :  { %v5293_v33 = vld [vmem:[%s7061_s1 + $0x284] ss:$16 sps:$4 sm:$0xff]   ;;  %v5303_v49 = vld [vmem:[%s7061_s1 + $0x2c0] ss:$16 sps:$4 sm:$0xff]   ;;  %v113_v51 = vld [vmem:[%s7060_s0 + $0x1c8] sm:$0xff] }
  0x48   :  { %v133_v10 = vld [vmem:[%s7060_s0 + $0x268] sm:$0xff]  ;;  %v5329_v11 = vld [vmem:[%s7061_s1 + $0x344] ss:$16 sps:$4 sm:$0xff]   ;;  %v147_v24 = vld [vmem:[%s7060_s0 + $0x2d8] sm:$0xff] }
  0x49   :  { %1464 = vmatpush1.bf16.msra.mxu0 %v5223_v34  ;;  %1916 = vmatpush1.bf16.msra.mxu1 %v5224_v35  ;;  %v5296_v34 = vld [vmem:[%s7061_s1 + $0x28c] ss:$16 sps:$4 sm:$0xff]   ;;  %v5291_v35 = vld [vmem:[%s7061_s1 + $0x280] ss:$16 sps:$4 sm:$0xff]   ;;  %v5335_v18 = vld [vmem:[%s7061_s1 + $0x364] ss:$16 sps:$4 sm:$0xff]  }
  0x4a   :  { %1465 = vmatprep.subr.bf16.mxu0 %v5225_v36  ;;  %1917 = vmatprep.subr.bf16.mxu1 %v5227_v37  ;;  %v5294_v36 = vld [vmem:[%s7061_s1 + $0x288] ss:$16 sps:$4 sm:$0xff]   ;;  %v182_v37 = vpack.c.bf16 %v91_v32, %v84_v31  ;;  %v148_v17 = vld [vmem:[%s7060_s0 + $0x2e0] sm:$0xff]  ;;  %v162_v31 = vld [vmem:[%s7060_s0 + $0x350] sm:$0xff] }
  0x4b   :  { %v5341_v25 = vld [vmem:[%s7061_s1 + $0x384] ss:$16 sps:$4 sm:$0xff]  }
  0x4c   :  { %v5347_v32 = vld [vmem:[%s7061_s1 + $0x3a4] ss:$16 sps:$4 sm:$0xff]  }
  0x4d   :  { %1466 = vmatpush1.bf16.msra.mxu0 %v5229_v38  ;;  %1918 = vmatpush1.bf16.msra.mxu1 %v5230_v39  ;;  %v99_v38 = vld [vmem:[%s7060_s0 + $0x158] sm:$0xff]  ;;  %v106_v39 = vld [vmem:[%s7060_s0 + $0x190] sm:$0xff] }
  0x4e   :  { %1467 = vmatprep.subr.bf16.mxu0 %v5231_v40  ;;  %1919 = vmatprep.subr.bf16.mxu1 %v5233_v41  ;;  %v5299_v40 = vld [vmem:[%s7061_s1 + $0x2a4] ss:$16 sps:$4 sm:$0xff]   ;;  %v5302_v41 = vld [vmem:[%s7061_s1 + $0x2ac] ss:$16 sps:$4 sm:$0xff]  }
  0x51   :  { %1468 = vmatpush1.bf16.msra.mxu0 %v5235_v42  ;;  %1920 = vmatpush1.bf16.msra.mxu1 %v5236_v43  ;;  %v5297_v42 = vld [vmem:[%s7061_s1 + $0x2a0] ss:$16 sps:$4 sm:$0xff]   ;;  %v190_v43 = vpack.c.bf16 %v106_v39, %v99_v38  ;;  %v161_v38 = vld [vmem:[%s7060_s0 + $0x348] sm:$0xff]  ;;  %v5353_v39 = vld [vmem:[%s7061_s1 + $0x3c4] ss:$16 sps:$4 sm:$0xff]  }
  0x52   :  { %1469 = vmatprep.subr.bf16.mxu0 %v5237_v44  ;;  %1921 = vmatprep.subr.bf16.mxu1 %v5239_v45  ;;  %v5300_v44 = vld [vmem:[%s7061_s1 + $0x2a8] ss:$16 sps:$4 sm:$0xff]   ;;  %v98_v45 = vld [vmem:[%s7060_s0 + $0x150] sm:$0xff] }
  0x55   :  { %1470 = vmatpush1.bf16.msra.mxu0 %v5241_v47  ;;  %1922 = vmatpush1.bf16.msra.mxu1 %v5242_v48  ;;  %v5305_v47 = vld [vmem:[%s7061_s1 + $0x2c4] ss:$16 sps:$4 sm:$0xff]   ;;  %v5308_v48 = vld [vmem:[%s7061_s1 + $0x2cc] ss:$16 sps:$4 sm:$0xff]  }
  0x56   :  { %1471 = vmatprep.subr.bf16.mxu0 %v5243_v50  ;;  %1923 = vmatprep.subr.bf16.mxu1 %v5245_v52  ;;  %v189_v50 = vpack.c.bf16 %v105_v46, %v98_v45  ;;  %v120_v52 = vld [vmem:[%s7060_s0 + $0x200] sm:$0xff]  ;;  %v66_v45 = vld [vmem:[%s7060_s0 + $0x50] sm:$0xff] }
  0x57   :  { %v5359_v46 = vld [vmem:[%s7061_s1 + $0x3e4] ss:$16 sps:$4 sm:$0xff]  }
  0x59   :  { %1472 = vmatpush1.bf16.msra.mxu0 %v5247_v53  ;;  %1924 = vmatpush1.bf16.msra.mxu1 %v5248_v54  ;;  %v5306_v53 = vld [vmem:[%s7061_s1 + $0x2c8] ss:$16 sps:$4 sm:$0xff]   ;;  %v5311_v54 = vld [vmem:[%s7061_s1 + $0x2e4] ss:$16 sps:$4 sm:$0xff]  }
  0x5a   :  { %1473 = vmatprep.subr.bf16.mxu0 %v5249_v55  ;;  %1925 = vmatprep.subr.bf16.mxu1 %v5251_v56  ;;  %v5314_v55 = vld [vmem:[%s7061_s1 + $0x2ec] ss:$16 sps:$4 sm:$0xff]   ;;  %v5309_v56 = vld [vmem:[%s7061_s1 + $0x2e0] ss:$16 sps:$4 sm:$0xff]  }
  0x5d   :  { %1474 = vmatpush1.bf16.msra.mxu0 %v5253_v57  ;;  %1926 = vmatpush1.bf16.msra.mxu1 %v5254_v58  ;;  %v5312_v57 = vld [vmem:[%s7061_s1 + $0x2e8] ss:$16 sps:$4 sm:$0xff]   ;;  %v197_v58 = vpack.c.bf16 %v120_v52, %v113_v51  ;;  %v58_v51 = vld [vmem:[%s7060_s0 + $0x10] sm:$0xff] }
  0x5e   :  { %1475 = vmatprep.subr.bf16.mxu0 %v5255_v59  ;;  %1927 = vmatprep.subr.bf16.mxu1 %v5257_v60  ;;  %v112_v59 = vld [vmem:[%s7060_s0 + $0x1c0] sm:$0xff]  ;;  %v119_v60 = vld [vmem:[%s7060_s0 + $0x1f8] sm:$0xff]  ;;  %v65_v52 = vld [vmem:[%s7060_s0 + $0x48] sm:$0xff] }
  0x61   :  { %1476 = vmatpush1.bf16.msra.mxu0 %v5259_v61  ;;  %1928 = vmatpush1.bf16.msra.mxu1 %v5260_v62  ;;  %v5317_v61 = vld [vmem:[%s7061_s1 + $0x304] ss:$16 sps:$4 sm:$0xff]   ;;  %v5320_v62 = vld [vmem:[%s7061_s1 + $0x30c] ss:$16 sps:$4 sm:$0xff]  }
  0x62   :  { %1477 = vmatprep.subr.bf16.mxu0 %v5261_v63  ;;  %1929 = vmatprep.subr.bf16.mxu1 %v5263_v0  ;;  %v196_v63 = vpack.c.bf16 %v119_v60, %v112_v59  ;;  %v127_v0 = vld [vmem:[%s7060_s0 + $0x238] sm:$0xff]  ;;  %v5371_v60 = vld [vmem:[%s7061_s1 + $0x424] ss:$16 sps:$4 sm:$0xff]  }
  0x63   :  { %v5366_v59 = vld [vmem:[%s7061_s1 + $0x408] ss:$16 sps:$4 sm:$0xff]  }
  0x65   :  { %1478 = vmatpush1.bf16.msra.mxu0 %v5265_v1  ;;  %1930 = vmatpush1.bf16.msra.mxu1 %v5266_v2  ;;  %v134_v1 = vld [vmem:[%s7060_s0 + $0x270] sm:$0xff] }
  0x66   :  { %1560 = vmatprep.subr.bf16.mxu0 %v5269_v5  ;;  %2012 = vmatprep.subr.bf16.mxu1 %v5272_v6  ;;  %v5315_v2 = vld [vmem:[%s7061_s1 + $0x300] ss:$16 sps:$4 sm:$0xff]   ;;  %v5326_v5 = vld [vmem:[%s7061_s1 + $0x32c] ss:$16 sps:$4 sm:$0xff]  }
  0x67   :  { %v5321_v6 = vld [vmem:[%s7061_s1 + $0x320] ss:$16 sps:$4 sm:$0xff]  }
  0x68   :  { %1480 = vmatmul.mubr.bf16.vlgmr.msra.gmra.mrb[0].mxu0 %v168_v8  ;;  %1932 = vmatmul.mubr.bf16.vlgmr.msra.gmra.mrb[0].mxu1 %v168_v8  ;;  %v204_v8 = vpack.c.bf16 %v134_v1, %v127_v0  ;;  %v72_v1 = vld [vmem:[%s7060_s0 + $0x80] sm:$0xff] }
  0x69   :  { %1561 = vmatpush1.bf16.msra.mxu0 %v5267_v7  ;;  %2013 = vmatpush1.bf16.msra.mxu1 %v5270_v9  ;;  %v5324_v7 = vld [vmem:[%s7061_s1 + $0x328] ss:$16 sps:$4 sm:$0xff]   ;;  %v126_v9 = vld [vmem:[%s7060_s0 + $0x230] sm:$0xff] }
  0x6a   :  { %1562 = vmatprep.subr.bf16.mxu0 %v5275_v12  ;;  %2014 = vmatprep.subr.bf16.mxu1 %v5278_v13  ;;  %v5332_v12 = vld [vmem:[%s7061_s1 + $0x34c] ss:$16 sps:$4 sm:$0xff]   ;;  %v5327_v13 = vld [vmem:[%s7061_s1 + $0x340] ss:$16 sps:$4 sm:$0xff]  }
  0x6b   :  { %1489 = vmatprep.mubr.bf16.mxu0 %v176_v15  ;;  %1941 = vmatprep.mubr.bf16.mxu1 %v176_v15  ;;  %v5330_v15 = vld [vmem:[%s7061_s1 + $0x348] ss:$16 sps:$4 sm:$0xff]  }
  0x6d   :  { %1563 = vmatpush1.bf16.msra.mxu0 %v5273_v14  ;;  %2015 = vmatpush1.bf16.msra.mxu1 %v5276_v16  ;;  %v203_v14 = vpack.c.bf16 %v133_v10, %v126_v9  ;;  %v141_v16 = vld [vmem:[%s7060_s0 + $0x2a8] sm:$0xff]  ;;  %v5383_v10 = vld [vmem:[%s7061_s1 + $0x464] ss:$16 sps:$4 sm:$0xff]  }
  0x6e   :  { %1564 = vmatprep.subr.bf16.mxu0 %v5281_v19  ;;  %2016 = vmatprep.subr.bf16.mxu1 %v5284_v20  ;;  %v5338_v19 = vld [vmem:[%s7061_s1 + $0x36c] ss:$16 sps:$4 sm:$0xff]   ;;  %v5333_v20 = vld [vmem:[%s7061_s1 + $0x360] ss:$16 sps:$4 sm:$0xff]   ;;  %v5378_v9 = vld [vmem:[%s7061_s1 + $0x448] ss:$16 sps:$4 sm:$0xff]  }
  0x70   :  { %1490 = vmatmul.mubr.bf16.gmra.mrb[4].mxu0 %v175_v23  ;;  %1942 = vmatmul.mubr.bf16.gmra.mrb[4].mxu1 %v175_v23  ;;  %v140_v23 = vld [vmem:[%s7060_s0 + $0x2a0] sm:$0xff] }
  0x71   :  { %1565 = vmatpush1.bf16.msra.mxu0 %v5279_v21  ;;  %2017 = vmatpush1.bf16.msra.mxu1 %v5282_v22  ;;  %v211_v21 = vpack.c.bf16 %v148_v17, %v141_v16  ;;  %v5336_v22 = vld [vmem:[%s7061_s1 + $0x368] ss:$16 sps:$4 sm:$0xff]   ;;  %v5389_v17 = vld [vmem:[%s7061_s1 + $0x484] ss:$16 sps:$4 sm:$0xff]  }
  0x72   :  { %1566 = vmatprep.subr.bf16.mxu0 %v5287_v26  ;;  %2018 = vmatprep.subr.bf16.mxu1 %v5290_v27  ;;  %v5344_v26 = vld [vmem:[%s7061_s1 + $0x38c] ss:$16 sps:$4 sm:$0xff]   ;;  %v5339_v27 = vld [vmem:[%s7061_s1 + $0x380] ss:$16 sps:$4 sm:$0xff]  }
  0x73   :  { %1499 = vmatprep.mubr.bf16.mxu0 %v183_v28  ;;  %1951 = vmatprep.mubr.bf16.mxu1 %v183_v28  ;;  %v5342_v28 = vld [vmem:[%s7061_s1 + $0x388] ss:$16 sps:$4 sm:$0xff]  }
  0x74   :  { %v93_v16 = vld [vmem:[%s7060_s0 + $0x128] sm:$0xff] }
  0x75   :  { %1567 = vmatpush1.bf16.msra.mxu0 %v5285_v29  ;;  %2019 = vmatpush1.bf16.msra.mxu1 %v5288_v30  ;;  %v210_v29 = vpack.c.bf16 %v147_v24, %v140_v23  ;;  %v155_v30 = vld [vmem:[%s7060_s0 + $0x318] sm:$0xff]  ;;  %v108_v23 = vld [vmem:[%s7060_s0 + $0x1a0] sm:$0xff] }
  0x76   :  { %1568 = vmatprep.subr.bf16.mxu0 %v5293_v33  ;;  %2020 = vmatprep.subr.bf16.mxu1 %v5296_v34  ;;  %v5350_v33 = vld [vmem:[%s7061_s1 + $0x3ac] ss:$16 sps:$4 sm:$0xff]   ;;  %v218_v34 = vpack.c.bf16 %v162_v31, %v155_v30  ;;  %v5395_v24 = vld [vmem:[%s7061_s1 + $0x4a4] ss:$16 sps:$4 sm:$0xff]  }
  0x77   :  { %v107_v30 = vld [vmem:[%s7060_s0 + $0x198] sm:$0xff]  ;;  %v5401_v31 = vld [vmem:[%s7061_s1 + $0x4c4] ss:$16 sps:$4 sm:$0xff]  }
  0x78   :  { %1500 = vmatmul.mubr.bf16.gmra.mrb[8].mxu0 %v182_v37  ;;  %1952 = vmatmul.mubr.bf16.gmra.mrb[8].mxu1 %v182_v37  ;;  %v154_v37 = vld [vmem:[%s7060_s0 + $0x310] sm:$0xff] }
  0x79   :  { %1569 = vmatpush1.bf16.msra.mxu0 %v5291_v35  ;;  %2021 = vmatpush1.bf16.msra.mxu1 %v5294_v36  ;;  %v5345_v35 = vld [vmem:[%s7061_s1 + $0x3a0] ss:$16 sps:$4 sm:$0xff]   ;;  %v5348_v36 = vld [vmem:[%s7061_s1 + $0x3a8] ss:$16 sps:$4 sm:$0xff]  }
  0x7a   :  { %1570 = vmatprep.subr.bf16.mxu0 %v5299_v40  ;;  %2022 = vmatprep.subr.bf16.mxu1 %v5302_v41  ;;  %v5356_v40 = vld [vmem:[%s7061_s1 + $0x3cc] ss:$16 sps:$4 sm:$0xff]   ;;  %v5351_v41 = vld [vmem:[%s7061_s1 + $0x3c0] ss:$16 sps:$4 sm:$0xff]  }
  0x7b   :  { %1509 = vmatprep.mubr.bf16.mxu0 %v190_v43  ;;  %1961 = vmatprep.mubr.bf16.mxu1 %v190_v43  ;;  %v217_v43 = vpack.c.bf16 %v161_v38, %v154_v37  ;;  %v5402_v37 = vld [vmem:[%s7061_s1 + $0x4c8] ss:$16 sps:$4 sm:$0xff]   ;;  %v5407_v38 = vld [vmem:[%s7061_s1 + $0x4e4] ss:$16 sps:$4 sm:$0xff]  }
  0x7d   :  { %1571 = vmatpush1.bf16.msra.mxu0 %v5297_v42  ;;  %2023 = vmatpush1.bf16.msra.mxu1 %v5300_v44  ;;  %v5354_v42 = vld [vmem:[%s7061_s1 + $0x3c8] ss:$16 sps:$4 sm:$0xff]  }
  0x7e   :  { %1572 = vmatprep.subr.bf16.mxu0 %v5305_v47  ;;  %2024 = vmatprep.subr.bf16.mxu1 %v5308_v48  ;;  %v59_v44 = vld [vmem:[%s7060_s0 + $0x18] sm:$0xff]  ;;  %v5357_v48 = vld [vmem:[%s7061_s1 + $0x3e0] ss:$16 sps:$4 sm:$0xff]  }
  0x7f   :  { %v5362_v47 = vld [vmem:[%s7061_s1 + $0x3ec] ss:$16 sps:$4 sm:$0xff]  }
  0x80   :  { %1510 = vmatmul.mubr.bf16.gmra.mrb[12].mxu0 %v189_v50  ;;  %1962 = vmatmul.mubr.bf16.gmra.mrb[12].mxu1 %v189_v50  ;;  %v5360_v50 = vld [vmem:[%s7061_s1 + $0x3e8] ss:$16 sps:$4 sm:$0xff]  }
  0x81   :  { %1573 = vmatpush1.bf16.msra.mxu0 %v5303_v49  ;;  %2025 = vmatpush1.bf16.msra.mxu1 %v5306_v53  ;;  %v171_v49 = vpack.c.bf16 %v66_v45, %v59_v44  ;;  %v5365_v53 = vld [vmem:[%s7061_s1 + $0x404] ss:$16 sps:$4 sm:$0xff]   ;;  %v121_v44 = vld [vmem:[%s7060_s0 + $0x208] sm:$0xff] }
  0x82   :  { %1574 = vmatprep.subr.bf16.mxu0 %v5311_v54  ;;  %2026 = vmatprep.subr.bf16.mxu1 %v5314_v55  ;;  %v5368_v54 = vld [vmem:[%s7061_s1 + $0x40c] ss:$16 sps:$4 sm:$0xff]   ;;  %v5363_v55 = vld [vmem:[%s7061_s1 + $0x400] ss:$16 sps:$4 sm:$0xff]   ;;  %v5413_v45 = vld [vmem:[%s7061_s1 + $0x504] ss:$16 sps:$4 sm:$0xff]  }
  0x83   :  { %1519 = vmatprep.mubr.bf16.mxu0 %v197_v58  ;;  %1971 = vmatprep.mubr.bf16.mxu1 %v197_v58  ;;  %v80_v58 = vld [vmem:[%s7060_s0 + $0xc0] sm:$0xff] }
  0x85   :  { %1575 = vmatpush1.bf16.msra.mxu0 %v5309_v56  ;;  %2027 = vmatpush1.bf16.msra.mxu1 %v5312_v57  ;;  %v170_v56 = vpack.c.bf16 %v65_v52, %v58_v51  ;;  %v73_v57 = vld [vmem:[%s7060_s0 + $0x88] sm:$0xff]  ;;  %v5419_v52 = vld [vmem:[%s7061_s1 + $0x524] ss:$16 sps:$4 sm:$0xff]  }
  0x86   :  { %1576 = vmatprep.subr.bf16.mxu0 %v5317_v61  ;;  %2028 = vmatprep.subr.bf16.mxu1 %v5320_v62  ;;  %v5374_v61 = vld [vmem:[%s7061_s1 + $0x42c] ss:$16 sps:$4 sm:$0xff]   ;;  %v5369_v62 = vld [vmem:[%s7061_s1 + $0x420] ss:$16 sps:$4 sm:$0xff]   ;;  %v178_v0 = vpack.c.bf16 %v80_v58, %v73_v57  ;;  %v5414_v51 = vld [vmem:[%s7061_s1 + $0x508] ss:$16 sps:$4 sm:$0xff]  }
  0x87   :  { %v128_v57 = vld [vmem:[%s7060_s0 + $0x240] sm:$0xff]  ;;  %v135_v58 = vld [vmem:[%s7060_s0 + $0x278] sm:$0xff] }
  0x88   :  { %1520 = vmatmul.mubr.bf16.gmra.mrb[16].mxu0 %v196_v63  ;;  %1972 = vmatmul.mubr.bf16.gmra.mrb[16].mxu1 %v196_v63  ;;  %v5372_v63 = vld [vmem:[%s7061_s1 + $0x428] ss:$16 sps:$4 sm:$0xff]  }
  0x89   :  { %1577 = vmatpush1.bf16.msra.mxu0 %v5315_v2  ;;  %2029 = vmatpush1.bf16.msra.mxu1 %v5318_v3  ;;  %v79_v2 = vld [vmem:[%s7060_s0 + $0xb8] sm:$0xff]  ;;  %v5377_v3 = vld [vmem:[%s7061_s1 + $0x444] ss:$16 sps:$4 sm:$0xff]  }
  0x8a   :  { %1578 = vmatprep.subr.bf16.mxu0 %v5323_v4  ;;  %2030 = vmatprep.subr.bf16.mxu1 %v5326_v5  ;;  %v5380_v4 = vld [vmem:[%s7061_s1 + $0x44c] ss:$16 sps:$4 sm:$0xff]   ;;  %v177_v5 = vpack.c.bf16 %v79_v2, %v72_v1  ;;  %v205_v1 = vpack.c.bf16 %v135_v58, %v128_v57  ;;  %v5431_v2 = vld [vmem:[%s7061_s1 + $0x564] ss:$16 sps:$4 sm:$0xff]  }
  0x8b   :  { %1529 = vmatprep.mubr.bf16.mxu0 %v204_v8  ;;  %1981 = vmatprep.mubr.bf16.mxu1 %v204_v8  ;;  %v5375_v8 = vld [vmem:[%s7061_s1 + $0x440] ss:$16 sps:$4 sm:$0xff]  }
  0x8d   :  { %1579 = vmatpush1.bf16.msra.mxu0 %v5321_v6  ;;  %2031 = vmatpush1.bf16.msra.mxu1 %v5324_v7  ;;  %v87_v6 = vld [vmem:[%s7060_s0 + $0xf8] sm:$0xff]  ;;  %v94_v7 = vld [vmem:[%s7060_s0 + $0x130] sm:$0xff] }
  0x8e   :  { %1580 = vmatprep.subr.bf16.mxu0 %v5329_v11  ;;  %2032 = vmatprep.subr.bf16.mxu1 %v5332_v12  ;;  %v5386_v11 = vld [vmem:[%s7061_s1 + $0x46c] ss:$16 sps:$4 sm:$0xff]   ;;  %v5381_v12 = vld [vmem:[%s7061_s1 + $0x460] ss:$16 sps:$4 sm:$0xff]  }
  0x90   :  { %1530 = vmatmul.mubr.bf16.gmra.mrb[20].mxu0 %v203_v14  ;;  %1982 = vmatmul.mubr.bf16.gmra.mrb[20].mxu1 %v203_v14  ;;  %v185_v14 = vpack.c.bf16 %v94_v7, %v87_v6  ;;  %v142_v7 = vld [vmem:[%s7060_s0 + $0x2b0] sm:$0xff] }
  0x91   :  { %1581 = vmatpush1.bf16.msra.mxu0 %v5327_v13  ;;  %2033 = vmatpush1.bf16.msra.mxu1 %v5330_v15  ;;  %v5384_v13 = vld [vmem:[%s7061_s1 + $0x468] ss:$16 sps:$4 sm:$0xff]   ;;  %v86_v15 = vld [vmem:[%s7060_s0 + $0xf0] sm:$0xff] }
  0x92   :  { %1582 = vmatprep.subr.bf16.mxu0 %v5335_v18  ;;  %2034 = vmatprep.subr.bf16.mxu1 %v5338_v19  ;;  %v5392_v18 = vld [vmem:[%s7061_s1 + $0x48c] ss:$16 sps:$4 sm:$0xff]   ;;  %v5387_v19 = vld [vmem:[%s7061_s1 + $0x480] ss:$16 sps:$4 sm:$0xff]  }
  0x93   :  { %1539 = vmatprep.mubr.bf16.mxu0 %v211_v21  ;;  %1991 = vmatprep.mubr.bf16.mxu1 %v211_v21  ;;  %v5390_v21 = vld [vmem:[%s7061_s1 + $0x488] ss:$16 sps:$4 sm:$0xff]  }
  0x95   :  { %1583 = vmatpush1.bf16.msra.mxu0 %v5333_v20  ;;  %2035 = vmatpush1.bf16.msra.mxu1 %v5336_v22  ;;  %v184_v20 = vpack.c.bf16 %v93_v16, %v86_v15  ;;  %v101_v22 = vld [vmem:[%s7060_s0 + $0x168] sm:$0xff]  ;;  %v5443_v16 = vld [vmem:[%s7061_s1 + $0x5a4] ss:$16 sps:$4 sm:$0xff]  }
  0x96   :  { %1584 = vmatprep.subr.bf16.mxu0 %v5341_v25  ;;  %2036 = vmatprep.subr.bf16.mxu1 %v5344_v26  ;;  %v5398_v25 = vld [vmem:[%s7061_s1 + $0x4ac] ss:$16 sps:$4 sm:$0xff]   ;;  %v5393_v26 = vld [vmem:[%s7061_s1 + $0x4a0] ss:$16 sps:$4 sm:$0xff]  }
  0x98   :  { %1540 = vmatmul.mubr.bf16.gmra.mrb[24].mxu0 %v210_v29  ;;  %1992 = vmatmul.mubr.bf16.gmra.mrb[24].mxu1 %v210_v29  ;;  %v100_v29 = vld [vmem:[%s7060_s0 + $0x160] sm:$0xff] }
  0x99   :  { %1585 = vmatpush1.bf16.msra.mxu0 %v5339_v27  ;;  %2037 = vmatpush1.bf16.msra.mxu1 %v5342_v28  ;;  %v192_v27 = vpack.c.bf16 %v108_v23, %v101_v22  ;;  %v5396_v28 = vld [vmem:[%s7061_s1 + $0x4a8] ss:$16 sps:$4 sm:$0xff]   ;;  %v5449_v23 = vld [vmem:[%s7061_s1 + $0x5c4] ss:$16 sps:$4 sm:$0xff]  }
  0x9a   :  { %1586 = vmatprep.subr.bf16.mxu0 %v5347_v32  ;;  %2038 = vmatprep.subr.bf16.mxu1 %v5350_v33  ;;  %v5404_v32 = vld [vmem:[%s7061_s1 + $0x4cc] ss:$16 sps:$4 sm:$0xff]   ;;  %v191_v33 = vpack.c.bf16 %v107_v30, %v100_v29  ;;  %v5455_v30 = vld [vmem:[%s7061_s1 + $0x5e4] ss:$16 sps:$4 sm:$0xff]  }
  0x9b   :  { %1549 = vmatprep.mubr.bf16.mxu0 %v218_v34  ;;  %2001 = vmatprep.mubr.bf16.mxu1 %v218_v34  ;;  %v115_v34 = vld [vmem:[%s7060_s0 + $0x1d8] sm:$0xff] }
  0x9c   :  { %v163_v22 = vld [vmem:[%s7060_s0 + $0x358] sm:$0xff] }
  0x9d   :  { %1587 = vmatpush1.bf16.msra.mxu0 %v5345_v35  ;;  %2039 = vmatpush1.bf16.msra.mxu1 %v5348_v36  ;;  %v122_v35 = vld [vmem:[%s7060_s0 + $0x210] sm:$0xff] }
  0x9e   :  { %1588 = vmatprep.subr.bf16.mxu0 %v5353_v39  ;;  %2040 = vmatprep.subr.bf16.mxu1 %v5356_v40  ;;  %v5399_v36 = vld [vmem:[%s7061_s1 + $0x4c0] ss:$16 sps:$4 sm:$0xff]   ;;  %v5410_v39 = vld [vmem:[%s7061_s1 + $0x4ec] ss:$16 sps:$4 sm:$0xff]   ;;  %v199_v40 = vpack.c.bf16 %v122_v35, %v115_v34  ;;  %v5456_v34 = vld [vmem:[%s7061_s1 + $0x5e8] ss:$16 sps:$4 sm:$0xff]  }
  0x9f   :  { %v60_v35 = vld [vmem:[%s7060_s0 + $0x20] sm:$0xff] }
  0xa0   :  { %1550 = vmatmul.mubr.bf16.gmra.mrb[28].mxu0 %v217_v43  ;;  %2002 = vmatmul.mubr.bf16.gmra.mrb[28].mxu1 %v217_v43  ;;  %v114_v43 = vld [vmem:[%s7060_s0 + $0x1d0] sm:$0xff] }
  0xa1   :  { %1589 = vmatpush1.bf16.msra.mxu0 %v5351_v41  ;;  %2041 = vmatpush1.bf16.msra.mxu1 %v5354_v42  ;;  %v5405_v41 = vld [vmem:[%s7061_s1 + $0x4e0] ss:$16 sps:$4 sm:$0xff]   ;;  %v5408_v42 = vld [vmem:[%s7061_s1 + $0x4e8] ss:$16 sps:$4 sm:$0xff]  }
  0xa2   :  { %1590 = vmatprep.subr.bf16.mxu0 %v5359_v46  ;;  %2042 = vmatprep.subr.bf16.mxu1 %v5362_v47  ;;  %v5416_v46 = vld [vmem:[%s7061_s1 + $0x50c] ss:$16 sps:$4 sm:$0xff]   ;;  %v198_v47 = vpack.c.bf16 %v121_v44, %v114_v43  ;;  %v5462_v44 = vld [vmem:[%s7061_s1 + $0x608] ss:$16 sps:$4 sm:$0xff]  }
  0xa3   :  { %1592 = vmatprep.mubr.bf16.mxu0 %v171_v49  ;;  %2044 = vmatprep.mubr.bf16.mxu1 %v171_v49  ;;  %v136_v49 = vld [vmem:[%s7060_s0 + $0x280] sm:$0xff] }
  0xa5   :  { %1591 = vmatpush1.bf16.msra.mxu0 %v5357_v48  ;;  %2043 = vmatpush1.bf16.msra.mxu1 %v5360_v50  ;;  %v129_v48 = vld [vmem:[%s7060_s0 + $0x248] sm:$0xff]  ;;  %v5411_v50 = vld [vmem:[%s7061_s1 + $0x500] ss:$16 sps:$4 sm:$0xff]  }
  0xa6   :  { %1673 = vmatprep.subr.bf16.mxu0 %v5365_v53  ;;  %2125 = vmatprep.subr.bf16.mxu1 %v5368_v54  ;;  %v5422_v53 = vld [vmem:[%s7061_s1 + $0x52c] ss:$16 sps:$4 sm:$0xff]   ;;  %v206_v54 = vpack.c.bf16 %v136_v49, %v129_v48 }
  0xa7   :  { %v81_v48 = vld [vmem:[%s7060_s0 + $0xc8] sm:$0xff] }
  0xa8   :  { %1593 = vmatmul.mubr.bf16.vlgmr.msra.gmra.mrb[0].mxu0 %v170_v56  ;;  %2045 = vmatmul.mubr.bf16.vlgmr.msra.gmra.mrb[0].mxu1 %v170_v56  ;;  %v5420_v56 = vld [vmem:[%s7061_s1 + $0x528] ss:$16 sps:$4 sm:$0xff]  }
  0xa9   :  { %1674 = vmatpush1.bf16.msra.mxu0 %v5363_v55  ;;  %2126 = vmatpush1.bf16.msra.mxu1 %v5366_v59  ;;  %v5417_v55 = vld [vmem:[%s7061_s1 + $0x520] ss:$16 sps:$4 sm:$0xff]   ;;  %v5425_v59 = vld [vmem:[%s7061_s1 + $0x544] ss:$16 sps:$4 sm:$0xff]   ;;  %v89_v49 = vld [vmem:[%s7060_s0 + $0x108] sm:$0xff] }
  0xaa   :  { %1675 = vmatprep.subr.bf16.mxu0 %v5371_v60  ;;  %2127 = vmatprep.subr.bf16.mxu1 %v5374_v61  ;;  %v5428_v60 = vld [vmem:[%s7061_s1 + $0x54c] ss:$16 sps:$4 sm:$0xff]   ;;  %v5423_v61 = vld [vmem:[%s7061_s1 + $0x540] ss:$16 sps:$4 sm:$0xff]  }
  0xab   :  { %1602 = vmatprep.mubr.bf16.mxu0 %v178_v0  ;;  %2054 = vmatprep.mubr.bf16.mxu1 %v178_v0  ;;  %v150_v0 = vld [vmem:[%s7060_s0 + $0x2f0] sm:$0xff] }
  0xad   :  { %1676 = vmatpush1.bf16.msra.mxu0 %v5369_v62  ;;  %2128 = vmatpush1.bf16.msra.mxu1 %v5372_v63  ;;  %v5426_v62 = vld [vmem:[%s7061_s1 + $0x548] ss:$16 sps:$4 sm:$0xff]  }
  0xae   :  { %1677 = vmatprep.subr.bf16.mxu0 %v5377_v3  ;;  %2129 = vmatprep.subr.bf16.mxu1 %v5380_v4  ;;  %v143_v63 = vld [vmem:[%s7060_s0 + $0x2b8] sm:$0xff]  ;;  %v5429_v4 = vld [vmem:[%s7061_s1 + $0x560] ss:$16 sps:$4 sm:$0xff]  }
  0xaf   :  { %v5434_v3 = vld [vmem:[%s7061_s1 + $0x56c] ss:$16 sps:$4 sm:$0xff]   ;;  %v213_v6 = vpack.c.bf16 %v150_v0, %v143_v63 }
  0xb0   :  { %1603 = vmatmul.mubr.bf16.gmra.mrb[4].mxu0 %v177_v5  ;;  %2055 = vmatmul.mubr.bf16.gmra.mrb[4].mxu1 %v177_v5  ;;  %v5432_v5 = vld [vmem:[%s7061_s1 + $0x568] ss:$16 sps:$4 sm:$0xff]  }
  0xb1   :  { %1678 = vmatpush1.bf16.msra.mxu0 %v5375_v8  ;;  %2130 = vmatpush1.bf16.msra.mxu1 %v5378_v9  ;;  %v149_v8 = vld [vmem:[%s7060_s0 + $0x2e8] sm:$0xff]  ;;  %v5437_v9 = vld [vmem:[%s7061_s1 + $0x584] ss:$16 sps:$4 sm:$0xff]  }
  0xb2   :  { %1679 = vmatprep.subr.bf16.mxu0 %v5383_v10  ;;  %2131 = vmatprep.subr.bf16.mxu1 %v5386_v11  ;;  %v5440_v10 = vld [vmem:[%s7061_s1 + $0x58c] ss:$16 sps:$4 sm:$0xff]   ;;  %v212_v15 = vpack.c.bf16 %v149_v8, %v142_v7  ;;  %v130_v7 = vld [vmem:[%s7060_s0 + $0x250] sm:$0xff] }
  0xb3   :  { %1612 = vmatprep.mubr.bf16.mxu0 %v185_v14  ;;  %2064 = vmatprep.mubr.bf16.mxu1 %v185_v14  ;;  %v157_v11 = vld [vmem:[%s7060_s0 + $0x328] sm:$0xff] }
  0xb4   :  { %v5438_v14 = vld [vmem:[%s7061_s1 + $0x588] ss:$16 sps:$4 sm:$0xff]  }
  0xb5   :  { %1680 = vmatpush1.bf16.msra.mxu0 %v5381_v12  ;;  %2132 = vmatpush1.bf16.msra.mxu1 %v5384_v13  ;;  %v164_v12 = vld [vmem:[%s7060_s0 + $0x360] sm:$0xff]  ;;  %v137_v8 = vld [vmem:[%s7060_s0 + $0x288] sm:$0xff] }
  0xb6   :  { %1681 = vmatprep.subr.bf16.mxu0 %v5389_v17  ;;  %2133 = vmatprep.subr.bf16.mxu1 %v5392_v18  ;;  %v5435_v13 = vld [vmem:[%s7061_s1 + $0x580] ss:$16 sps:$4 sm:$0xff]   ;;  %v5446_v17 = vld [vmem:[%s7061_s1 + $0x5ac] ss:$16 sps:$4 sm:$0xff]  }
  0xb7   :  { %v5441_v18 = vld [vmem:[%s7061_s1 + $0x5a0] ss:$16 sps:$4 sm:$0xff]  }
  0xb8   :  { %1613 = vmatmul.mubr.bf16.gmra.mrb[8].mxu0 %v184_v20  ;;  %2065 = vmatmul.mubr.bf16.gmra.mrb[8].mxu1 %v184_v20  ;;  %v220_v20 = vpack.c.bf16 %v164_v12, %v157_v11  ;;  %v207_v11 = vpack.c.bf16 %v137_v8, %v130_v7  ;;  %v5516_v7 = vld [vmem:[#allocation2 + $0x108] ss:$16 sps:$4 sm:$0xff]   ;;  %v5521_v8 = vld [vmem:[#allocation2 + $0x124] ss:$16 sps:$4 sm:$0xff]  }
  0xb9   :  { %1682 = vmatpush1.bf16.msra.mxu0 %v5387_v19  ;;  %2134 = vmatpush1.bf16.msra.mxu1 %v5390_v21  ;;  %v5444_v19 = vld [vmem:[%s7061_s1 + $0x5a8] ss:$16 sps:$4 sm:$0xff]   ;;  %v156_v21 = vld [vmem:[%s7060_s0 + $0x320] sm:$0xff] }
  0xba   :  { %1683 = vmatprep.subr.bf16.mxu0 %v5395_v24  ;;  %2135 = vmatprep.subr.bf16.mxu1 %v5398_v25  ;;  %v5452_v24 = vld [vmem:[%s7061_s1 + $0x5cc] ss:$16 sps:$4 sm:$0xff]   ;;  %v219_v29 = vpack.c.bf16 %v163_v22, %v156_v21  ;;  %v5767_v22 = vmov 0  }
  0xbb   :  { %1622 = vmatprep.mubr.bf16.mxu0 %v192_v27  ;;  %2074 = vmatprep.mubr.bf16.mxu1 %v192_v27  ;;  %v61_v25 = vld [vmem:[%s7060_s0 + $0x28] sm:$0xff]  ;;  %v5447_v27 = vld [vmem:[%s7061_s1 + $0x5c0] ss:$16 sps:$4 sm:$0xff]  }
  0xbd   :  { %1684 = vmatpush1.bf16.msra.mxu0 %v5393_v26  ;;  %2136 = vmatpush1.bf16.msra.mxu1 %v5396_v28  ;;  %v68_v26 = vld [vmem:[%s7060_s0 + $0x60] sm:$0xff]  ;;  %v5450_v28 = vld [vmem:[%s7061_s1 + $0x5c8] ss:$16 sps:$4 sm:$0xff]  }
  0xbe   :  { %1685 = vmatprep.subr.bf16.mxu0 %v5401_v31  ;;  %2137 = vmatprep.subr.bf16.mxu1 %v5404_v32  ;;  %v5458_v31 = vld [vmem:[%s7061_s1 + $0x5ec] ss:$16 sps:$4 sm:$0xff]   ;;  %v173_v32 = vpack.c.bf16 %v68_v26, %v61_v25  ;;  %v5465_v26 = vld [vmem:[#allocation2] ss:$16 sps:$4 sm:$0xff]  }
  0xc0   :  { %1623 = vmatmul.mubr.bf16.gmra.mrb[12].mxu0 %v191_v33  ;;  %2075 = vmatmul.mubr.bf16.gmra.mrb[12].mxu1 %v191_v33  ;;  %v5453_v33 = vld [vmem:[%s7061_s1 + $0x5e0] ss:$16 sps:$4 sm:$0xff]  }
  0xc1   :  { %1686 = vmatpush1.bf16.msra.mxu0 %v5399_v36  ;;  %2138 = vmatpush1.bf16.msra.mxu1 %v5402_v37  ;;  %v67_v36 = vld [vmem:[%s7060_s0 + $0x58] sm:$0xff]  ;;  %v5461_v37 = vld [vmem:[%s7061_s1 + $0x604] ss:$16 sps:$4 sm:$0xff]  }
  0xc2   :  { %1687 = vmatprep.subr.bf16.mxu0 %v5407_v38  ;;  %2139 = vmatprep.subr.bf16.mxu1 %v5410_v39  ;;  %v75_v38 = vld [vmem:[%s7060_s0 + $0x98] sm:$0xff]  ;;  %v82_v39 = vld [vmem:[%s7060_s0 + $0xd0] sm:$0xff] }
  0xc3   :  { %1632 = vmatprep.mubr.bf16.mxu0 %v199_v40  ;;  %2084 = vmatprep.mubr.bf16.mxu1 %v199_v40  ;;  %v5464_v40 = vld [vmem:[%s7061_s1 + $0x60c] ss:$16 sps:$4 sm:$0xff]   ;;  %v180_v43 = vpack.c.bf16 %v82_v39, %v75_v38  ;;  %v5480_v38 = vld [vmem:[#allocation2 + $0x48] ss:$16 sps:$4 sm:$0xff]   ;;  %v5485_v39 = vld [vmem:[#allocation2 + $0x64] ss:$16 sps:$4 sm:$0xff]  }
  0xc5   :  { %1688 = vmatpush1.bf16.msra.mxu0 %v5405_v41  ;;  %2140 = vmatpush1.bf16.msra.mxu1 %v5408_v42  ;;  %v172_v41 = vpack.c.bf16 %v67_v36, %v60_v35  ;;  %v5459_v42 = vld [vmem:[%s7061_s1 + $0x600] ss:$16 sps:$4 sm:$0xff]   ;;  %v5482_v35 = vld [vmem:[#allocation2 + $0x4c] ss:$16 sps:$4 sm:$0xff]  }
  0xc6   :  { %1689 = vmatprep.subr.bf16.mxu0 %v5413_v45  ;;  %2141 = vmatprep.subr.bf16.mxu1 %v5416_v46  ;;  %v5467_v45 = vld [vmem:[#allocation2 + $0x4] ss:$16 sps:$4 sm:$0xff]   ;;  %v5470_v46 = vld [vmem:[#allocation2 + $0xc] ss:$16 sps:$4 sm:$0xff]  }
  0xc8   :  { %1633 = vmatmul.mubr.bf16.gmra.mrb[16].mxu0 %v198_v47  ;;  %2085 = vmatmul.mubr.bf16.gmra.mrb[16].mxu1 %v198_v47  ;;  %v74_v47 = vld [vmem:[%s7060_s0 + $0x90] sm:$0xff] }
  0xc9   :  { %1690 = vmatpush1.bf16.msra.mxu0 %v5411_v50  ;;  %2142 = vmatpush1.bf16.msra.mxu1 %v5414_v51  ;;  %v96_v50 = vld [vmem:[%s7060_s0 + $0x140] sm:$0xff]  ;;  %v179_v51 = vpack.c.bf16 %v81_v48, %v74_v47 }
  0xca   :  { %1691 = vmatprep.subr.bf16.mxu0 %v5419_v52  ;;  %2143 = vmatprep.subr.bf16.mxu1 %v5422_v53  ;;  %v187_v52 = vpack.c.bf16 %v96_v50, %v89_v49  ;;  %v88_v53 = vld [vmem:[%s7060_s0 + $0x100] sm:$0xff]  ;;  %v5492_v49 = vld [vmem:[#allocation2 + $0x88] ss:$16 sps:$4 sm:$0xff]  }
  0xcb   :  { %1642 = vmatprep.mubr.bf16.mxu0 %v206_v54  ;;  %2094 = vmatprep.mubr.bf16.mxu1 %v206_v54  ;;  %v95_v54 = vld [vmem:[%s7060_s0 + $0x138] sm:$0xff]  ;;  %v5489_v48 = vld [vmem:[#allocation2 + $0x80] ss:$16 sps:$4 sm:$0xff]   ;;  %v5497_v50 = vld [vmem:[#allocation2 + $0xa4] ss:$16 sps:$4 sm:$0xff]  }
  0xcc   :  { %v186_v57 = vpack.c.bf16 %v95_v54, %v88_v53  ;;  %v111_v53 = vld [vmem:[%s7060_s0 + $0x1b8] sm:$0xff]  ;;  %v5495_v54 = vld [vmem:[#allocation2 + $0xa0] ss:$16 sps:$4 sm:$0xff]  }
  0xcd   :  { %1692 = vmatpush1.bf16.msra.mxu0 %v5417_v55  ;;  %2144 = vmatpush1.bf16.msra.mxu1 %v5420_v56  ;;  %v103_v55 = vld [vmem:[%s7060_s0 + $0x178] sm:$0xff]  ;;  %v110_v56 = vld [vmem:[%s7060_s0 + $0x1b0] sm:$0xff] }
  0xce   :  { %1693 = vmatprep.subr.bf16.mxu0 %v5425_v59  ;;  %2145 = vmatprep.subr.bf16.mxu1 %v5428_v60  ;;  %v194_v58 = vpack.c.bf16 %v110_v56, %v103_v55  ;;  %v102_v59 = vld [vmem:[%s7060_s0 + $0x170] sm:$0xff]  ;;  %v109_v60 = vld [vmem:[%s7060_s0 + $0x1a8] sm:$0xff] }
  0xcf   :  { %v193_v63 = vpack.c.bf16 %v109_v60, %v102_v59  ;;  %v5498_v55 = vld [vmem:[#allocation2 + $0xa8] ss:$16 sps:$4 sm:$0xff]   ;;  %v5503_v56 = vld [vmem:[#allocation2 + $0xc4] ss:$16 sps:$4 sm:$0xff]   ;;  %v5501_v59 = vld [vmem:[#allocation2 + $0xc0] ss:$16 sps:$4 sm:$0xff]  }
  0xd0   :  { %1643 = vmatmul.mubr.bf16.gmra.mrb[20].mxu0 %v205_v1  ;;  %2095 = vmatmul.mubr.bf16.gmra.mrb[20].mxu1 %v205_v1  ;;  %v116_v1 = vld [vmem:[%s7060_s0 + $0x1e0] sm:$0xff]  ;;  %v5504_v60 = vld [vmem:[#allocation2 + $0xc8] ss:$16 sps:$4 sm:$0xff]  }
  0xd1   :  { %1694 = vmatpush1.bf16.msra.mxu0 %v5423_v61  ;;  %2146 = vmatpush1.bf16.msra.mxu1 %v5426_v62  ;;  %v117_v61 = vld [vmem:[%s7060_s0 + $0x1e8] sm:$0xff]  ;;  %v124_v62 = vld [vmem:[%s7060_s0 + $0x220] sm:$0xff] }
  0xd2   :  { %1695 = vmatprep.subr.bf16.mxu0 %v5431_v2  ;;  %2147 = vmatprep.subr.bf16.mxu1 %v5434_v3  ;;  %v201_v0 = vpack.c.bf16 %v124_v62, %v117_v61  ;;  %v123_v2 = vld [vmem:[%s7060_s0 + $0x218] sm:$0xff]  ;;  %v5509_v61 = vld [vmem:[#allocation2 + $0xe4] ss:$16 sps:$4 sm:$0xff]  }
  0xd3   :  { %1652 = vmatprep.mubr.bf16.mxu0 %v213_v6  ;;  %2104 = vmatprep.mubr.bf16.mxu1 %v213_v6  ;;  %v131_v3 = vld [vmem:[%s7060_s0 + $0x258] sm:$0xff] }
  0xd4   :  { %v5512_v62 = vld [vmem:[#allocation2 + $0xec] ss:$16 sps:$4 sm:$0xff]  }
  0xd5   :  { %1696 = vmatpush1.bf16.msra.mxu0 %v5429_v4  ;;  %2148 = vmatpush1.bf16.msra.mxu1 %v5432_v5  ;;  %v138_v4 = vld [vmem:[%s7060_s0 + $0x290] sm:$0xff]  ;;  %v200_v5 = vpack.c.bf16 %v123_v2, %v116_v1  ;;  %v5510_v2 = vld [vmem:[#allocation2 + $0xe8] ss:$16 sps:$4 sm:$0xff]  }
  0xd6   :  { %1697 = vmatprep.subr.bf16.mxu0 %v5437_v9  ;;  %2149 = vmatprep.subr.bf16.mxu1 %v5440_v10  ;;  %v208_v6 = vpack.c.bf16 %v138_v4, %v131_v3  ;;  %v145_v9 = vld [vmem:[%s7060_s0 + $0x2c8] sm:$0xff]  ;;  %v152_v10 = vld [vmem:[%s7060_s0 + $0x300] sm:$0xff] }
  0xd7   :  { %v215_v12 = vpack.c.bf16 %v152_v10, %v145_v9  ;;  %v5507_v1 = vld [vmem:[#allocation2 + $0xe0] ss:$16 sps:$4 sm:$0xff]   ;;  %v5515_v3 = vld [vmem:[#allocation2 + $0x104] ss:$16 sps:$4 sm:$0xff]   ;;  %v5518_v4 = vld [vmem:[#allocation2 + $0x10c] ss:$16 sps:$4 sm:$0xff]  }
  0xd8   :  { %1653 = vmatmul.mubr.bf16.gmra.mrb[24].mxu0 %v212_v15  ;;  %2105 = vmatmul.mubr.bf16.gmra.mrb[24].mxu1 %v212_v15  ;;  %v159_v15 = vld [vmem:[%s7060_s0 + $0x338] sm:$0xff]  ;;  %v132_v10 = vld [vmem:[%s7060_s0 + $0x260] sm:$0xff] }
  0xd9   :  { %1698 = vmatpush1.bf16.msra.mxu0 %v5435_v13  ;;  %2150 = vmatpush1.bf16.msra.mxu1 %v5438_v14  ;;  %v144_v13 = vld [vmem:[%s7060_s0 + $0x2c0] sm:$0xff]  ;;  %v151_v14 = vld [vmem:[%s7060_s0 + $0x2f8] sm:$0xff] }
  0xda   :  { %1699 = vmatprep.subr.bf16.mxu0 %v5443_v16  ;;  %2151 = vmatprep.subr.bf16.mxu1 %v5446_v17  ;;  %v166_v16 = vld [vmem:[%s7060_s0 + $0x370] sm:$0xff]  ;;  %v214_v17 = vpack.c.bf16 %v151_v14, %v144_v13  ;;  %v5524_v9 = vld [vmem:[#allocation2 + $0x12c] ss:$16 sps:$4 sm:$0xff]   ;;  %v5522_v13 = vld [vmem:[#allocation2 + $0x128] ss:$16 sps:$4 sm:$0xff]  }
  0xdb   :  { %1662 = vmatprep.mubr.bf16.mxu0 %v220_v20  ;;  %2114 = vmatprep.mubr.bf16.mxu1 %v220_v20  ;;  %v165_v20 = vld [vmem:[%s7060_s0 + $0x368] sm:$0xff]  ;;  %v5527_v14 = vld [vmem:[#allocation2 + $0x144] ss:$16 sps:$4 sm:$0xff]  }
  0xdd   :  { %1700 = vmatpush1.bf16.msra.mxu0 %v5441_v18  ;;  %2152 = vmatpush1.bf16.msra.mxu1 %v5444_v19  ;;  %v222_v18 = vpack.c.bf16 %v166_v16, %v159_v15  ;;  %v158_v19 = vld [vmem:[%s7060_s0 + $0x330] sm:$0xff]  ;;  %v5530_v15 = vld [vmem:[#allocation2 + $0x14c] ss:$16 sps:$4 sm:$0xff]  }
  0xde   :  { %1701 = vmatprep.subr.bf16.mxu0 %v5449_v23  ;;  %2153 = vmatprep.subr.bf16.mxu1 %v5452_v24  ;;  %v221_v21 = vpack.c.bf16 %v165_v20, %v158_v19  ;;  %v62_v23 = vld [vmem:[%s7060_s0 + $0x30] sm:$0xff]  ;;  %v69_v24 = vld [vmem:[%s7060_s0 + $0x68] sm:$0xff] }
  0xdf   :  { %v174_v25 = vpack.c.bf16 %v69_v24, %v62_v23  ;;  %v5533_v19 = vld [vmem:[#allocation2 + $0x164] ss:$16 sps:$4 sm:$0xff]   ;;  %v5536_v20 = vld [vmem:[#allocation2 + $0x16c] ss:$16 sps:$4 sm:$0xff]   ;;  %v5531_v24 = vld [vmem:[#allocation2 + $0x160] ss:$16 sps:$4 sm:$0xff]  }
  0xe0   :  { %1663 = vmatmul.mubr.bf16.gmra.mrb[28].mxu0 %v219_v29  ;;  %2115 = vmatmul.mubr.bf16.gmra.mrb[28].mxu1 %v219_v29  ;;  %v5476_v29 = vld [vmem:[#allocation2 + $0x2c] ss:$16 sps:$4 sm:$0xff]  }
  0xe1   :  { %1702 = vmatpush1.bf16.msra.mxu0 %v5447_v27  ;;  %2154 = vmatpush1.bf16.msra.mxu1 %v5450_v28  ;;  %v5468_v27 = vld [vmem:[#allocation2 + $0x8] ss:$16 sps:$4 sm:$0xff]   ;;  %v5473_v28 = vld [vmem:[#allocation2 + $0x24] ss:$16 sps:$4 sm:$0xff]  }
  0xe2   :  { %1703 = vmatprep.subr.bf16.mxu0 %v5455_v30  ;;  %2155 = vmatprep.subr.bf16.mxu1 %v5458_v31  ;;  %v76_v30 = vld [vmem:[%s7060_s0 + $0xa0] sm:$0xff]  ;;  %v83_v31 = vld [vmem:[%s7060_s0 + $0xd8] sm:$0xff]  ;;  %v153_v23 = vld [vmem:[%s7060_s0 + $0x308] sm:$0xff] }
  0xe3   :  { %1705 = vmatprep.mubr.bf16.mxu0 %v173_v32  ;;  %2157 = vmatprep.mubr.bf16.mxu1 %v173_v32  ;;  %v5471_v32 = vld [vmem:[#allocation2 + $0x20] ss:$16 sps:$4 sm:$0xff]   ;;  %v181_v36 = vpack.c.bf16 %v83_v31, %v76_v30  ;;  %v5540_v30 = vld [vmem:[#allocation2 + $0x188] ss:$16 sps:$4 sm:$0xff]   ;;  %v5545_v31 = vld [vmem:[#allocation2 + $0x1a4] ss:$16 sps:$4 sm:$0xff]  }
  0xe5   :  { %1704 = vmatpush1.bf16.msra.mxu0 %v5453_v33  ;;  %2156 = vmatpush1.bf16.msra.mxu1 %v5456_v34  ;;  %v5474_v33 = vld [vmem:[#allocation2 + $0x28] ss:$16 sps:$4 sm:$0xff]   ;;  %v5479_v34 = vld [vmem:[#allocation2 + $0x44] ss:$16 sps:$4 sm:$0xff]  }
  0xe6   :  { %1786 = vmatprep.subr.bf16.mxu0 %v5461_v37  ;;  %2238 = vmatprep.subr.bf16.mxu1 %v5464_v40  ;;  %v5477_v37 = vld [vmem:[#allocation2 + $0x40] ss:$16 sps:$4 sm:$0xff]   ;;  %v5488_v40 = vld [vmem:[#allocation2 + $0x6c] ss:$16 sps:$4 sm:$0xff]  }
  0xe8   :  { %1706 = vmatmul.mubr.bf16.vlgmr.msra.gmra.mrb[0].mxu0 %v172_v41  ;;  %2158 = vmatmul.mubr.bf16.vlgmr.msra.gmra.mrb[0].mxu1 %v172_v41  ;;  %v90_v41 = vld [vmem:[%s7060_s0 + $0x110] sm:$0xff] }
  0xe9   :  { %1787 = vmatpush1.bf16.msra.mxu0 %v5459_v42  ;;  %1715 = vmatprep.mubr.bf16.mxu0 %v180_v43  ;;  %v97_v42 = vld [vmem:[%s7060_s0 + $0x148] sm:$0xff] }
  0xea   :  { %2167 = vmatprep.mubr.bf16.mxu1 %v180_v43  ;;  %2239 = vmatpush1.bf16.msra.mxu1 %v5462_v44  ;;  %v5483_v43 = vld [vmem:[#allocation2 + $0x60] ss:$16 sps:$4 sm:$0xff]   ;;  %v5486_v44 = vld [vmem:[#allocation2 + $0x68] ss:$16 sps:$4 sm:$0xff]   ;;  %v188_v47 = vpack.c.bf16 %v97_v42, %v90_v41  ;;  %v5557_v41 = vld [vmem:[#allocation2 + $0x1e4] ss:$16 sps:$4 sm:$0xff]  }
  0xeb   :  { %3237 = vmatprep.subr.bf16.mxu0 %v5467_v45  ;;  %3463 = vmatprep.subr.bf16.mxu1 %v5470_v46  ;;  %v5491_v45 = vld [vmem:[#allocation2 + $0x84] ss:$16 sps:$4 sm:$0xff]   ;;  %v5494_v46 = vld [vmem:[#allocation2 + $0x8c] ss:$16 sps:$4 sm:$0xff]  }
  0xec   :  { %v5560_v42 = vld [vmem:[#allocation2 + $0x1ec] ss:$16 sps:$4 sm:$0xff]  }
  0xf0   :  { %1716 = vmatmul.mubr.bf16.gmra.mrb[4].mxu0 %v179_v51  ;;  %2168 = vmatmul.mubr.bf16.gmra.mrb[4].mxu1 %v179_v51  ;;  %v5500_v51 = vld [vmem:[#allocation2 + $0xac] ss:$16 sps:$4 sm:$0xff]  }
  0xf1   :  { %1725 = vmatprep.mubr.bf16.mxu0 %v187_v52  ;;  %2177 = vmatprep.mubr.bf16.mxu1 %v187_v52  ;;  %v104_v52 = vld [vmem:[%s7060_s0 + $0x180] sm:$0xff] }
  0xf8   :  { %1726 = vmatmul.mubr.bf16.gmra.mrb[8].mxu0 %v186_v57  ;;  %2178 = vmatmul.mubr.bf16.gmra.mrb[8].mxu1 %v186_v57  ;;  %v5506_v57 = vld [vmem:[#allocation2 + $0xcc] ss:$16 sps:$4 sm:$0xff]  }
  0xf9   :  { %1735 = vmatprep.mubr.bf16.mxu0 %v194_v58  ;;  %2187 = vmatprep.mubr.bf16.mxu1 %v194_v58  ;;  %v195_v58 = vpack.c.bf16 %v111_v53, %v104_v52 }
 0x100   :  { %1736 = vmatmul.mubr.bf16.gmra.mrb[12].mxu0 %v193_v63  ;;  %2188 = vmatmul.mubr.bf16.gmra.mrb[12].mxu1 %v193_v63  ;;  %v118_v63 = vld [vmem:[%s7060_s0 + $0x1f0] sm:$0xff] }
 0x101   :  { %1745 = vmatprep.mubr.bf16.mxu0 %v201_v0  ;;  %2197 = vmatprep.mubr.bf16.mxu1 %v201_v0  ;;  %v125_v0 = vld [vmem:[%s7060_s0 + $0x228] sm:$0xff] }
 0x108   :  { %1746 = vmatmul.mubr.bf16.gmra.mrb[16].mxu0 %v200_v5  ;;  %2198 = vmatmul.mubr.bf16.gmra.mrb[16].mxu1 %v200_v5  ;;  %v202_v5 = vpack.c.bf16 %v125_v0, %v118_v63 }
 0x109   :  { %1755 = vmatprep.mubr.bf16.mxu0 %v208_v6  ;;  %2207 = vmatprep.mubr.bf16.mxu1 %v208_v6  ;;  %v5513_v6 = vld [vmem:[#allocation2 + $0x100] ss:$16 sps:$4 sm:$0xff]  }
 0x110   :  { %1756 = vmatmul.mubr.bf16.gmra.mrb[20].mxu0 %v207_v11  ;;  %2208 = vmatmul.mubr.bf16.gmra.mrb[20].mxu1 %v207_v11  ;;  %v139_v11 = vld [vmem:[%s7060_s0 + $0x298] sm:$0xff] }
 0x111   :  { %1765 = vmatprep.mubr.bf16.mxu0 %v215_v12  ;;  %2217 = vmatprep.mubr.bf16.mxu1 %v215_v12  ;;  %v5519_v12 = vld [vmem:[#allocation2 + $0x120] ss:$16 sps:$4 sm:$0xff]   ;;  %v209_v16 = vpack.c.bf16 %v139_v11, %v132_v10 }
 0x118   :  { %1766 = vmatmul.mubr.bf16.gmra.mrb[24].mxu0 %v214_v17  ;;  %2218 = vmatmul.mubr.bf16.gmra.mrb[24].mxu1 %v214_v17  ;;  %v5525_v17 = vld [vmem:[#allocation2 + $0x140] ss:$16 sps:$4 sm:$0xff]  }
 0x119   :  { %1775 = vmatprep.mubr.bf16.mxu0 %v222_v18  ;;  %2227 = vmatprep.mubr.bf16.mxu1 %v222_v18  ;;  %v5528_v18 = vld [vmem:[#allocation2 + $0x148] ss:$16 sps:$4 sm:$0xff]  }
 0x120   :  { %1776 = vmatmul.mubr.bf16.gmra.mrb[28].mxu0 %v221_v21  ;;  %2228 = vmatmul.mubr.bf16.gmra.mrb[28].mxu1 %v221_v21  ;;  %v146_v21 = vld [vmem:[%s7060_s0 + $0x2d0] sm:$0xff] }
 0x121   :  { %1818 = vmatprep.mubr.bf16.mxu0 %v5767_v22  ;;  %2270 = vmatprep.mubr.bf16.mxu1 %v5767_v22 }
 0x128   :  { %4472 = vmatmul.mubr.msk.bf16.vlgmr.msra.gmra.mrb[0].mxu0 %vm1422_vm0, %v174_v25  ;;  %4480 = vmatmul.mubr.msk.bf16.vlgmr.msra.gmra.mrb[0].mxu1 %vm1422_vm0, %v174_v25  ;;  %v5534_v25 = vld [vmem:[#allocation2 + $0x168] ss:$16 sps:$4 sm:$0xff]  }
 0x129   :  { %1828 = vmatprep.mubr.bf16.mxu0 %v5767_v22  ;;  %2280 = vmatprep.mubr.bf16.mxu1 %v5767_v22 }
 0x12a   :  { %3238 = vmatpush1.bf16.msra.mxu0 %v5465_v26  ;;  %3464 = vmatpush1.bf16.msra.mxu1 %v5468_v27  ;;  %v5539_v26 = vld [vmem:[#allocation2 + $0x184] ss:$16 sps:$4 sm:$0xff]   ;;  %v5542_v27 = vld [vmem:[#allocation2 + $0x18c] ss:$16 sps:$4 sm:$0xff]  }
 0x12b   :  { %3239 = vmatprep.subr.bf16.mxu0 %v5473_v28  ;;  %3465 = vmatprep.subr.bf16.mxu1 %v5476_v29  ;;  %v216_v28 = vpack.c.bf16 %v153_v23, %v146_v21  ;;  %v5537_v29 = vld [vmem:[#allocation2 + $0x180] ss:$16 sps:$4 sm:$0xff]  }
 0x12e   :  { %3240 = vmatpush1.bf16.msra.mxu0 %v5471_v32  ;;  %3466 = vmatpush1.bf16.msra.mxu1 %v5474_v33  ;;  %v5548_v32 = vld [vmem:[#allocation2 + $0x1ac] ss:$16 sps:$4 sm:$0xff]   ;;  %v160_v33 = vld [vmem:[%s7060_s0 + $0x340] sm:$0xff] }
 0x12f   :  { %3241 = vmatprep.subr.bf16.mxu0 %v5479_v34  ;;  %3467 = vmatprep.subr.bf16.mxu1 %v5482_v35  ;;  %v167_v34 = vld [vmem:[%s7060_s0 + $0x378] sm:$0xff]  ;;  %v5543_v35 = vld [vmem:[#allocation2 + $0x1a0] ss:$16 sps:$4 sm:$0xff]  }
 0x130   :  { %4473 = vmatmul.mubr.msk.bf16.gmra.mrb[4].mxu0 %vm1422_vm0, %v181_v36  ;;  %4481 = vmatmul.mubr.msk.bf16.gmra.mrb[4].mxu1 %vm1422_vm0, %v181_v36  ;;  %v5546_v36 = vld [vmem:[#allocation2 + $0x1a8] ss:$16 sps:$4 sm:$0xff]  }
 0x131   :  { %1838 = vmatprep.mubr.bf16.mxu0 %v5767_v22  ;;  %2290 = vmatprep.mubr.bf16.mxu1 %v5767_v22 }
 0x132   :  { %3242 = vmatpush1.bf16.msra.mxu0 %v5477_v37  ;;  %3468 = vmatpush1.bf16.msra.mxu1 %v5480_v38  ;;  %v223_v37 = vpack.c.bf16 %v167_v34, %v160_v33  ;;  %v5554_v38 = vld [vmem:[#allocation2 + $0x1cc] ss:$16 sps:$4 sm:$0xff]  }
 0x133   :  { %3243 = vmatprep.subr.bf16.mxu0 %v5485_v39  ;;  %3469 = vmatprep.subr.bf16.mxu1 %v5488_v40  ;;  %v5549_v39 = vld [vmem:[#allocation2 + $0x1c0] ss:$16 sps:$4 sm:$0xff]   ;;  %v5552_v40 = vld [vmem:[#allocation2 + $0x1c8] ss:$16 sps:$4 sm:$0xff]  }
 0x136   :  { %3244 = vmatpush1.bf16.msra.mxu0 %v5483_v43  ;;  %3470 = vmatpush1.bf16.msra.mxu1 %v5486_v44  ;;  %v5555_v43 = vld [vmem:[#allocation2 + $0x1e0] ss:$16 sps:$4 sm:$0xff]   ;;  %v5558_v44 = vld [vmem:[#allocation2 + $0x1e8] ss:$16 sps:$4 sm:$0xff]  }
 0x137   :  { %3245 = vmatprep.subr.bf16.mxu0 %v5491_v45  ;;  %3471 = vmatprep.subr.bf16.mxu1 %v5494_v46  ;;  %v5563_v45 = vld [vmem:[#allocation2 + $0x204] ss:$16 sps:$4 sm:$0xff]   ;;  %v5566_v46 = vld [vmem:[#allocation2 + $0x20c] ss:$16 sps:$4 sm:$0xff]  }
 0x138   :  { %4474 = vmatmul.mubr.msk.bf16.gmra.mrb[8].mxu0 %vm1422_vm0, %v188_v47  ;;  %4482 = vmatmul.mubr.msk.bf16.gmra.mrb[8].mxu1 %vm1422_vm0, %v188_v47  ;;  %v422_v47 = vlaneseq }
 0x139   :  { %1848 = vmatprep.mubr.bf16.mxu0 %v5767_v22  ;;  %2300 = vmatprep.mubr.bf16.mxu1 %v5767_v22 }
 0x13a   :  { %3246 = vmatpush1.bf16.msra.mxu0 %v5489_v48  ;;  %3472 = vmatpush1.bf16.msra.mxu1 %v5492_v49  ;;  %v6791_v48 = vshrl.u32 %v422_v47, 7 }
 0x13b   :  { %3247 = vmatprep.subr.bf16.mxu0 %v5497_v50  ;;  %3473 = vmatprep.subr.bf16.mxu1 %v5500_v51  ;;  %v420_v51 = vld [vmem:[%s7062_s2] sm:$0xf] }
 0x13c   :  { %v424_v49 = vsub.s32 0, %v6791_v48  ;;  %v432_v50 = vsub.s32 2, %v6791_v48  ;;  %v428_v52 = vsub.s32 1, %v6791_v48  ;;  %v436_v53 = vsub.s32 3, %v6791_v48 }
 0x13e   :  { %3248 = vmatpush1.bf16.msra.mxu0 %v5495_v54  ;;  %3474 = vmatpush1.bf16.msra.mxu1 %v5498_v55  ;;  %v6802_v54 = vrot.slane %v420_v51, %v424_v49  ;;  %v6806_v55 = vrot.slane %v420_v51, %v432_v50 }
 0x13f   :  { %3249 = vmatprep.subr.bf16.mxu0 %v5503_v56  ;;  %3475 = vmatprep.subr.bf16.mxu1 %v5506_v57  ;;  %v6810_v56 = vrot.slane %v420_v51, %v428_v52  ;;  %v6814_v57 = vrot.slane %v420_v51, %v436_v53 }
 0x140   :  { %4475 = vmatmul.mubr.msk.bf16.gmra.mrb[12].mxu0 %vm1422_vm0, %v195_v58  ;;  %4483 = vmatmul.mubr.msk.bf16.gmra.mrb[12].mxu1 %vm1422_vm0, %v195_v58 }
 0x141   :  { %1858 = vmatprep.mubr.bf16.mxu0 %v5767_v22  ;;  %2310 = vmatprep.mubr.bf16.mxu1 %v5767_v22 }
 0x142   :  { %3250 = vmatpush1.bf16.msra.mxu0 %v5501_v59  ;;  %3476 = vmatpush1.bf16.msra.mxu1 %v5504_v60 }
 0x143   :  { %3251 = vmatprep.subr.bf16.mxu0 %v5509_v61  ;;  %3477 = vmatprep.subr.bf16.mxu1 %v5512_v62 }
 0x146   :  { %3252 = vmatpush1.bf16.msra.mxu0 %v5507_v1  ;;  %3478 = vmatpush1.bf16.msra.mxu1 %v5510_v2 }
 0x147   :  { %3253 = vmatprep.subr.bf16.mxu0 %v5515_v3  ;;  %3479 = vmatprep.subr.bf16.mxu1 %v5518_v4 }
 0x148   :  { %4476 = vmatmul.mubr.msk.bf16.gmra.mrb[16].mxu0 %vm1422_vm0, %v202_v5  ;;  %4484 = vmatmul.mubr.msk.bf16.gmra.mrb[16].mxu1 %vm1422_vm0, %v202_v5 }
 0x149   :  { %1868 = vmatprep.mubr.bf16.mxu0 %v5767_v22  ;;  %2320 = vmatprep.mubr.bf16.mxu1 %v5767_v22 }
 0x14a   :  { %3254 = vmatpush1.bf16.msra.mxu0 %v5513_v6  ;;  %3480 = vmatpush1.bf16.msra.mxu1 %v5516_v7 }
 0x14b   :  { %3255 = vmatprep.subr.bf16.mxu0 %v5521_v8  ;;  %3481 = vmatprep.subr.bf16.mxu1 %v5524_v9 }
 0x14e   :  { %3256 = vmatpush1.bf16.msra.mxu0 %v5519_v12  ;;  %3482 = vmatpush1.bf16.msra.mxu1 %v5522_v13 }
 0x14f   :  { %3257 = vmatprep.subr.bf16.mxu0 %v5527_v14  ;;  %3483 = vmatprep.subr.bf16.mxu1 %v5530_v15 }
 0x150   :  { %4477 = vmatmul.mubr.msk.bf16.gmra.mrb[20].mxu0 %vm1422_vm0, %v209_v16  ;;  %4485 = vmatmul.mubr.msk.bf16.gmra.mrb[20].mxu1 %vm1422_vm0, %v209_v16 }
 0x151   :  { %1878 = vmatprep.mubr.bf16.mxu0 %v5767_v22  ;;  %2330 = vmatprep.mubr.bf16.mxu1 %v5767_v22 }
 0x152   :  { %3258 = vmatpush1.bf16.msra.mxu0 %v5525_v17  ;;  %3484 = vmatpush1.bf16.msra.mxu1 %v5528_v18 }
 0x153   :  { %3259 = vmatprep.subr.bf16.mxu0 %v5533_v19  ;;  %3485 = vmatprep.subr.bf16.mxu1 %v5536_v20 }
 0x156   :  { %3260 = vmatpush1.bf16.msra.mxu0 %v5531_v24  ;;  %3486 = vmatpush1.bf16.msra.mxu1 %v5534_v25  ;;  %v5561_v25 = vld [vmem:[#allocation2 + $0x200] ss:$16 sps:$4 sm:$0xff]  }
 0x157   :  { %3261 = vmatprep.subr.bf16.mxu0 %v5539_v26  ;;  %3487 = vmatprep.subr.bf16.mxu1 %v5542_v27  ;;  %v5564_v26 = vld [vmem:[#allocation2 + $0x208] ss:$16 sps:$4 sm:$0xff]  }
 0x158   :  { %4478 = vmatmul.mubr.msk.bf16.gmra.mrb[24].mxu0 %vm1422_vm0, %v216_v28  ;;  %4486 = vmatmul.mubr.msk.bf16.gmra.mrb[24].mxu1 %vm1422_vm0, %v216_v28 }
 0x159   :  { %1888 = vmatprep.mubr.bf16.mxu0 %v5767_v22  ;;  %2340 = vmatprep.mubr.bf16.mxu1 %v5767_v22  ;;  %v5551_v22 = vld [vmem:[#allocation2 + $0x1c4] ss:$16 sps:$4 sm:$0xff]  }
 0x15a   :  { %3262 = vmatpush1.bf16.msra.mxu0 %v5537_v29  ;;  %3488 = vmatpush1.bf16.msra.mxu1 %v5540_v30 }
 0x15b   :  { %3263 = vmatprep.subr.bf16.mxu0 %v5545_v31  ;;  %3489 = vmatprep.subr.bf16.mxu1 %v5548_v32  ;;  %v5569_v31 = vld [vmem:[#allocation2 + $0x224] ss:$16 sps:$4 sm:$0xff]   ;;  %v5572_v32 = vld [vmem:[#allocation2 + $0x22c] ss:$16 sps:$4 sm:$0xff]  }
 0x15e   :  { %3264 = vmatpush1.bf16.msra.mxu0 %v5543_v35  ;;  %3490 = vmatpush1.bf16.msra.mxu1 %v5546_v36 }
 0x15f   :  { %3265 = vmatprep.subr.bf16.mxu0 %v5551_v22  ;;  %3491 = vmatprep.subr.bf16.mxu1 %v5554_v38 }
 0x160   :  { %4479 = vmatmul.mubr.msk.bf16.gmra.mrb[28].mxu0 %vm1422_vm0, %v223_v37  ;;  %4487 = vmatmul.mubr.msk.bf16.gmra.mrb[28].mxu1 %vm1422_vm0, %v223_v37 }
 0x162   :  { %3266 = vmatpush1.bf16.msra.mxu0 %v5549_v39  ;;  %3492 = vmatpush1.bf16.msra.mxu1 %v5552_v40 }
 0x163   :  { %3267 = vmatprep.subr.bf16.mxu0 %v5557_v41  ;;  %3493 = vmatprep.subr.bf16.mxu1 %v5560_v42  ;;  %v5567_v42 = vld [vmem:[#allocation2 + $0x220] ss:$16 sps:$4 sm:$0xff]  }
 0x166   :  { %3268 = vmatpush1.bf16.msra.mxu0 %v5555_v43  ;;  %3494 = vmatpush1.bf16.msra.mxu1 %v5558_v44  ;;  %v5570_v43 = vld [vmem:[#allocation2 + $0x228] ss:$16 sps:$4 sm:$0xff]   ;;  %v5575_v44 = vld [vmem:[#allocation2 + $0x244] ss:$16 sps:$4 sm:$0xff]  }
 0x167   :  { %3350 = vmatprep.subr.bf16.mxu0 %v5563_v45  ;;  %3576 = vmatprep.subr.bf16.mxu1 %v5566_v46 }
 0x1fb   :  { %v1820_v58 = vpop.f32.mrb[0].mxu0  ;;  %v2272_v59 = vpop.f32.mrb[0].mxu1 }
 0x1fc   :  { %v4777_v60 = vadd.f32 %v1820_v58, %v6802_v54  ;;  %v4809_v61 = vadd.f32 %v2272_v59, %v6806_v55  ;;  %v1822_v62 = vpop.f32.mrb[1].mxu0  ;;  %v2274_v63 = vpop.f32.mrb[1].mxu1  ;;  %v5578_v58 = vld [vmem:[#allocation2 + $0x24c] ss:$16 sps:$4 sm:$0xff]  }
 0x1fd   :  { %v4778_v0 = vadd.f32 %v1822_v62, %v6810_v56  ;;  %v4810_v1 = vadd.f32 %v2274_v63, %v6814_v57  ;;  %v1824_v2 = vpop.f32.mrb[2].mxu0  ;;  %v2276_v3 = vpop.f32.mrb[2].mxu1 }
 0x1fe   :  { %v4779_v4 = vadd.f32 %v1824_v2, %v6802_v54  ;;  %v4811_v5 = vadd.f32 %v2276_v3, %v6806_v55  ;;  %v1826_v6 = vpop.f32.mrb[3].mxu0  ;;  %v2278_v7 = vpop.f32.mrb[3].mxu1  ;;  %v2351_v10 = vmax.f32 %v4777_v60, 0.0  ;;  %v2353_v11 = vmax.f32 %v4809_v61, 0.0 }
 0x1ff   :  { %v4780_v8 = vadd.f32 %v1826_v6, %v6810_v56  ;;  %v4812_v9 = vadd.f32 %v2278_v7, %v6814_v57  ;;  %v2352_v14 = vmax.f32 %v4778_v0, 0.0  ;;  %v2354_v15 = vmax.f32 %v4810_v1, 0.0  ;;  %v5576_v6 = vld [vmem:[#allocation2 + $0x248] ss:$16 sps:$4 sm:$0xff]  }
 0x200   :  { %v2355_v12 = vmax.f32 %v4779_v4, 0.0  ;;  %v2357_v13 = vmax.f32 %v4811_v5, 0.0  ;;  %v5573_v5 = vld [vmem:[#allocation2 + $0x240] ss:$16 sps:$4 sm:$0xff]  }
 0x201   :  { %v2356_v16 = vmax.f32 %v4780_v8, 0.0  ;;  %v2358_v17 = vmax.f32 %v4812_v9, 0.0 }
 0x202   :  { %v2415_v18 = vpack.c.bf16 %v2355_v12, %v2351_v10  ;;  %v6824_v19 = vpack.c.bf16 %v2357_v13, %v2353_v11  ;;  %v5581_v11 = vld [vmem:[#allocation2 + $0x264] ss:$16 sps:$4 sm:$0xff]   ;;  %v5584_v12 = vld [vmem:[#allocation2 + $0x26c] ss:$16 sps:$4 sm:$0xff]  }
 0x203   :  { %v2416_v20 = vpack.c.bf16 %v2356_v16, %v2352_v14  ;;  %v6826_v21 = vpack.c.bf16 %v2358_v17, %v2354_v15  ;;  %v1830_v23 = vpop.f32.mrb[4].mxu0  ;;  %v2282_v24 = vpop.f32.mrb[4].mxu1 }
 0x204   :  { %v4781_v27 = vadd.f32 %v1830_v23, %v6802_v54  ;;  %v4813_v28 = vadd.f32 %v2282_v24, %v6806_v55  ;;  %v1832_v29 = vpop.f32.mrb[5].mxu0  ;;  %v2284_v30 = vpop.f32.mrb[5].mxu1 }
 0x205   :  { %v4782_v33 = vadd.f32 %v1832_v29, %v6810_v56  ;;  %v4814_v34 = vadd.f32 %v2284_v30, %v6814_v57  ;;  %v1834_v35 = vpop.f32.mrb[6].mxu0  ;;  %v2286_v36 = vpop.f32.mrb[6].mxu1  ;;  %3269 = vmatprep.mubr.bf16.mxu0 %v2416_v20  ;;  %3495 = vmatprep.mubr.bf16.mxu1 %v2416_v20 }
 0x206   :  { %v4783_v37 = vadd.f32 %v1834_v35, %v6802_v54  ;;  %v4815_v22 = vadd.f32 %v2286_v36, %v6806_v55  ;;  %v1836_v38 = vpop.f32.mrb[7].mxu0  ;;  %v2288_v39 = vpop.f32.mrb[7].mxu1  ;;  %3270 = vmatmul.mubr.bf16.vlgmr.msra.gmra.mrb[32].mxu0 %v2415_v18  ;;  %3496 = vmatmul.mubr.bf16.vlgmr.msra.gmra.mrb[32].mxu1 %v2415_v18  ;;  %v2359_v45 = vmax.f32 %v4781_v27, 0.0  ;;  %v2361_v46 = vmax.f32 %v4813_v28, 0.0  ;;  %v5582_v27 = vld [vmem:[#allocation2 + $0x268] ss:$16 sps:$4 sm:$0xff]  }
 0x207   :  { %v4784_v40 = vadd.f32 %v1836_v38, %v6810_v56  ;;  %v4816_v41 = vadd.f32 %v2288_v39, %v6814_v57  ;;  %3351 = vmatpush1.bf16.msra.mxu0 %v5561_v25  ;;  %3577 = vmatpush1.bf16.msra.mxu1 %v5564_v26  ;;  %v2360_v59 = vmax.f32 %v4782_v33, 0.0  ;;  %v2362_v60 = vmax.f32 %v4814_v34, 0.0  ;;  %v5579_v26 = vld [vmem:[#allocation2 + $0x260] ss:$16 sps:$4 sm:$0xff]   ;;  %v5587_v28 = vld [vmem:[#allocation2 + $0x284] ss:$16 sps:$4 sm:$0xff]  }
 0x208   :  { %v2363_v47 = vmax.f32 %v4783_v37, 0.0  ;;  %v2365_v51 = vmax.f32 %v4815_v22, 0.0  ;;  %3352 = vmatprep.subr.bf16.mxu0 %v5569_v31  ;;  %3578 = vmatprep.subr.bf16.mxu1 %v5572_v32  ;;  %v5590_v33 = vld [vmem:[#allocation2 + $0x28c] ss:$16 sps:$4 sm:$0xff]  }
 0x209   :  { %v2364_v61 = vmax.f32 %v4784_v40, 0.0  ;;  %v2366_v62 = vmax.f32 %v4816_v41, 0.0 }
 0x20a   :  { %v2419_v63 = vpack.c.bf16 %v2363_v47, %v2359_v45  ;;  %v6836_v0 = vpack.c.bf16 %v2365_v51, %v2361_v46 }
 0x20b   :  { %v2420_v1 = vpack.c.bf16 %v2364_v61, %v2360_v59  ;;  %v6838_v2 = vpack.c.bf16 %v2366_v62, %v2362_v60  ;;  %v1840_v3 = vpop.f32.mrb[8].mxu0  ;;  %v2292_v4 = vpop.f32.mrb[8].mxu1  ;;  %3353 = vmatpush1.bf16.msra.mxu0 %v5567_v42  ;;  %3579 = vmatpush1.bf16.msra.mxu1 %v5570_v43  ;;  %v5585_v43 = vld [vmem:[#allocation2 + $0x280] ss:$16 sps:$4 sm:$0xff]   ;;  %v5596_v59 = vld [vmem:[#allocation2 + $0x2ac] ss:$16 sps:$4 sm:$0xff]  }
 0x20c   :  { %v4785_v7 = vadd.f32 %v1840_v3, %v6802_v54  ;;  %v4817_v8 = vadd.f32 %v2292_v4, %v6806_v55  ;;  %v1842_v9 = vpop.f32.mrb[9].mxu0  ;;  %v2294_v10 = vpop.f32.mrb[9].mxu1  ;;  %3354 = vmatprep.subr.bf16.mxu0 %v5575_v44  ;;  %3580 = vmatprep.subr.bf16.mxu1 %v5578_v58  ;;  %v5588_v44 = vld [vmem:[#allocation2 + $0x288] ss:$16 sps:$4 sm:$0xff]   ;;  %v5593_v58 = vld [vmem:[#allocation2 + $0x2a4] ss:$16 sps:$4 sm:$0xff]  }
 0x20d   :  { %v4786_v13 = vadd.f32 %v1842_v9, %v6810_v56  ;;  %v4818_v14 = vadd.f32 %v2294_v10, %v6814_v57  ;;  %v1844_v15 = vpop.f32.mrb[10].mxu0  ;;  %v2296_v16 = vpop.f32.mrb[10].mxu1  ;;  %3279 = vmatprep.mubr.bf16.mxu0 %v2420_v1  ;;  %3505 = vmatprep.mubr.bf16.mxu1 %v2420_v1  ;;  %v5594_v9 = vld [vmem:[#allocation2 + $0x2a8] ss:$16 sps:$4 sm:$0xff]   ;;  %v5599_v10 = vld [vmem:[#allocation2 + $0x2c4] ss:$16 sps:$4 sm:$0xff]  }
 0x20e   :  { %v4787_v17 = vadd.f32 %v1844_v15, %v6802_v54  ;;  %v4819_v18 = vadd.f32 %v2296_v16, %v6806_v55  ;;  %v1846_v20 = vpop.f32.mrb[11].mxu0  ;;  %v2298_v23 = vpop.f32.mrb[11].mxu1  ;;  %3280 = vmatmul.mubr.bf16.gmra.mrb[36].mxu0 %v2419_v63  ;;  %3506 = vmatmul.mubr.bf16.gmra.mrb[36].mxu1 %v2419_v63  ;;  %v2367_v29 = vmax.f32 %v4785_v7, 0.0  ;;  %v2369_v30 = vmax.f32 %v4817_v8, 0.0  ;;  %v5591_v8 = vld [vmem:[#allocation2 + $0x2a0] ss:$16 sps:$4 sm:$0xff]  }
 0x20f   :  { %v4788_v24 = vadd.f32 %v1846_v20, %v6810_v56  ;;  %v4820_v25 = vadd.f32 %v2298_v23, %v6814_v57  ;;  %3355 = vmatpush1.bf16.msra.mxu0 %v5573_v5  ;;  %3581 = vmatpush1.bf16.msra.mxu1 %v5576_v6  ;;  %v2368_v34 = vmax.f32 %v4786_v13, 0.0  ;;  %v2370_v35 = vmax.f32 %v4818_v14, 0.0  ;;  %v5602_v15 = vld [vmem:[#allocation2 + $0x2cc] ss:$16 sps:$4 sm:$0xff]  }
 0x210   :  { %v2371_v31 = vmax.f32 %v4787_v17, 0.0  ;;  %v2373_v32 = vmax.f32 %v4819_v18, 0.0  ;;  %3356 = vmatprep.subr.bf16.mxu0 %v5581_v11  ;;  %3582 = vmatprep.subr.bf16.mxu1 %v5584_v12 }
 0x211   :  { %v2372_v36 = vmax.f32 %v4788_v24, 0.0  ;;  %v2374_v37 = vmax.f32 %v4820_v25, 0.0 }
 0x212   :  { %v2423_v22 = vpack.c.bf16 %v2371_v31, %v2367_v29  ;;  %v6848_v38 = vpack.c.bf16 %v2373_v32, %v2369_v30  ;;  %v5597_v29 = vld [vmem:[#allocation2 + $0x2c0] ss:$16 sps:$4 sm:$0xff]   ;;  %v5600_v30 = vld [vmem:[#allocation2 + $0x2c8] ss:$16 sps:$4 sm:$0xff]  }
 0x213   :  { %v2424_v39 = vpack.c.bf16 %v2372_v36, %v2368_v34  ;;  %v6850_v40 = vpack.c.bf16 %v2374_v37, %v2370_v35  ;;  %v1850_v41 = vpop.f32.mrb[12].mxu0  ;;  %v2302_v42 = vpop.f32.mrb[12].mxu1  ;;  %3357 = vmatpush1.bf16.msra.mxu0 %v5579_v26  ;;  %3583 = vmatpush1.bf16.msra.mxu1 %v5582_v27  ;;  %v5605_v35 = vld [vmem:[#allocation2 + $0x2e4] ss:$16 sps:$4 sm:$0xff]   ;;  %v5608_v36 = vld [vmem:[#allocation2 + $0x2ec] ss:$16 sps:$4 sm:$0xff]  }
 0x214   :  { %v4789_v45 = vadd.f32 %v1850_v41, %v6802_v54  ;;  %v4821_v46 = vadd.f32 %v2302_v42, %v6806_v55  ;;  %v1852_v47 = vpop.f32.mrb[13].mxu0  ;;  %v2304_v51 = vpop.f32.mrb[13].mxu1  ;;  %3358 = vmatprep.subr.bf16.mxu0 %v5587_v28  ;;  %3584 = vmatprep.subr.bf16.mxu1 %v5590_v33 }
 0x215   :  { %v4790_v60 = vadd.f32 %v1852_v47, %v6810_v56  ;;  %v4822_v61 = vadd.f32 %v2304_v51, %v6814_v57  ;;  %v1854_v62 = vpop.f32.mrb[14].mxu0  ;;  %v2306_v63 = vpop.f32.mrb[14].mxu1  ;;  %3289 = vmatprep.mubr.bf16.mxu0 %v2424_v39  ;;  %3515 = vmatprep.mubr.bf16.mxu1 %v2424_v39  ;;  %v5603_v51 = vld [vmem:[#allocation2 + $0x2e0] ss:$16 sps:$4 sm:$0xff]  }
 0x216   :  { %v4791_v1 = vadd.f32 %v1854_v62, %v6802_v54  ;;  %v4823_v3 = vadd.f32 %v2306_v63, %v6806_v55  ;;  %v1856_v4 = vpop.f32.mrb[15].mxu0  ;;  %v2308_v5 = vpop.f32.mrb[15].mxu1  ;;  %3290 = vmatmul.mubr.bf16.gmra.mrb[40].mxu0 %v2423_v22  ;;  %3516 = vmatmul.mubr.bf16.gmra.mrb[40].mxu1 %v2423_v22  ;;  %v2375_v11 = vmax.f32 %v4789_v45, 0.0  ;;  %v2377_v12 = vmax.f32 %v4821_v46, 0.0 }
 0x217   :  { %v4792_v6 = vadd.f32 %v1856_v4, %v6810_v56  ;;  %v4824_v7 = vadd.f32 %v2308_v5, %v6814_v57  ;;  %3359 = vmatpush1.bf16.msra.mxu0 %v5585_v43  ;;  %3585 = vmatpush1.bf16.msra.mxu1 %v5588_v44  ;;  %v2376_v16 = vmax.f32 %v4790_v60, 0.0  ;;  %v2378_v17 = vmax.f32 %v4822_v61, 0.0 }
 0x218   :  { %v2379_v13 = vmax.f32 %v4791_v1, 0.0  ;;  %v2381_v14 = vmax.f32 %v4823_v3, 0.0  ;;  %3360 = vmatprep.subr.bf16.mxu0 %v5593_v58  ;;  %3586 = vmatprep.subr.bf16.mxu1 %v5596_v59  ;;  %v5606_v58 = vld [vmem:[#allocation2 + $0x2e8] ss:$16 sps:$4 sm:$0xff]   ;;  %v5611_v59 = vld [vmem:[#allocation2 + $0x304] ss:$16 sps:$4 sm:$0xff]  }
 0x219   :  { %v2380_v18 = vmax.f32 %v4792_v6, 0.0  ;;  %v2382_v20 = vmax.f32 %v4824_v7, 0.0  ;;  %v5614_v1 = vld [vmem:[#allocation2 + $0x30c] ss:$16 sps:$4 sm:$0xff]  }
 0x21a   :  { %v2427_v23 = vpack.c.bf16 %v2379_v13, %v2375_v11  ;;  %v6860_v24 = vpack.c.bf16 %v2381_v14, %v2377_v12  ;;  %v5609_v13 = vld [vmem:[#allocation2 + $0x300] ss:$16 sps:$4 sm:$0xff]   ;;  %v5612_v14 = vld [vmem:[#allocation2 + $0x308] ss:$16 sps:$4 sm:$0xff]  }
 0x21b   :  { %v2428_v25 = vpack.c.bf16 %v2380_v18, %v2376_v16  ;;  %v6862_v26 = vpack.c.bf16 %v2382_v20, %v2378_v17  ;;  %v1860_v27 = vpop.f32.mrb[16].mxu0  ;;  %v2312_v28 = vpop.f32.mrb[16].mxu1  ;;  %3361 = vmatpush1.bf16.msra.mxu0 %v5591_v8  ;;  %3587 = vmatpush1.bf16.msra.mxu1 %v5594_v9  ;;  %v5617_v20 = vld [vmem:[#allocation2 + $0x324] ss:$16 sps:$4 sm:$0xff]  }
 0x21c   :  { %v4793_v31 = vadd.f32 %v1860_v27, %v6802_v54  ;;  %v4825_v32 = vadd.f32 %v2312_v28, %v6806_v55  ;;  %v1862_v33 = vpop.f32.mrb[17].mxu0  ;;  %v2314_v34 = vpop.f32.mrb[17].mxu1  ;;  %3362 = vmatprep.subr.bf16.mxu0 %v5599_v10  ;;  %3588 = vmatprep.subr.bf16.mxu1 %v5602_v15 }
 0x21d   :  { %v4794_v37 = vadd.f32 %v1862_v33, %v6810_v56  ;;  %v4826_v22 = vadd.f32 %v2314_v34, %v6814_v57  ;;  %v1864_v39 = vpop.f32.mrb[18].mxu0  ;;  %v2316_v41 = vpop.f32.mrb[18].mxu1  ;;  %3299 = vmatprep.mubr.bf16.mxu0 %v2428_v25  ;;  %3525 = vmatprep.mubr.bf16.mxu1 %v2428_v25 }
 0x21e   :  { %v4795_v42 = vadd.f32 %v1864_v39, %v6802_v54  ;;  %v4827_v43 = vadd.f32 %v2316_v41, %v6806_v55  ;;  %v1866_v44 = vpop.f32.mrb[19].mxu0  ;;  %v2318_v45 = vpop.f32.mrb[19].mxu1  ;;  %3300 = vmatmul.mubr.bf16.gmra.mrb[44].mxu0 %v2427_v23  ;;  %3526 = vmatmul.mubr.bf16.gmra.mrb[44].mxu1 %v2427_v23  ;;  %v2383_v60 = vmax.f32 %v4793_v31, 0.0  ;;  %v2385_v61 = vmax.f32 %v4825_v32, 0.0  ;;  %v5620_v23 = vld [vmem:[#allocation2 + $0x32c] ss:$16 sps:$4 sm:$0xff]  }
 0x21f   :  { %v4796_v46 = vadd.f32 %v1866_v44, %v6810_v56  ;;  %v4828_v47 = vadd.f32 %v2318_v45, %v6814_v57  ;;  %3363 = vmatpush1.bf16.msra.mxu0 %v5597_v29  ;;  %3589 = vmatpush1.bf16.msra.mxu1 %v5600_v30  ;;  %v2384_v3 = vmax.f32 %v4794_v37, 0.0  ;;  %v2386_v4 = vmax.f32 %v4826_v22, 0.0  ;;  %v5618_v37 = vld [vmem:[#allocation2 + $0x328] ss:$16 sps:$4 sm:$0xff]   ;;  %v5623_v22 = vld [vmem:[#allocation2 + $0x344] ss:$16 sps:$4 sm:$0xff]  }
 0x220   :  { %v2387_v62 = vmax.f32 %v4795_v42, 0.0  ;;  %v2389_v63 = vmax.f32 %v4827_v43, 0.0  ;;  %3364 = vmatprep.subr.bf16.mxu0 %v5605_v35  ;;  %3590 = vmatprep.subr.bf16.mxu1 %v5608_v36  ;;  %v5615_v36 = vld [vmem:[#allocation2 + $0x320] ss:$16 sps:$4 sm:$0xff]   ;;  %v5626_v44 = vld [vmem:[#allocation2 + $0x34c] ss:$16 sps:$4 sm:$0xff]  }
 0x221   :  { %v2388_v5 = vmax.f32 %v4796_v46, 0.0  ;;  %v2390_v6 = vmax.f32 %v4828_v47, 0.0 }
 0x222   :  { %v2431_v7 = vpack.c.bf16 %v2387_v62, %v2383_v60  ;;  %v6872_v8 = vpack.c.bf16 %v2389_v63, %v2385_v61 }
 0x223   :  { %v2432_v9 = vpack.c.bf16 %v2388_v5, %v2384_v3  ;;  %v6874_v10 = vpack.c.bf16 %v2390_v6, %v2386_v4  ;;  %v1870_v11 = vpop.f32.mrb[20].mxu0  ;;  %v2322_v12 = vpop.f32.mrb[20].mxu1  ;;  %3365 = vmatpush1.bf16.msra.mxu0 %v5603_v51  ;;  %3591 = vmatpush1.bf16.msra.mxu1 %v5606_v58  ;;  %v5624_v3 = vld [vmem:[#allocation2 + $0x348] ss:$16 sps:$4 sm:$0xff]  }
 0x224   :  { %v4797_v15 = vadd.f32 %v1870_v11, %v6802_v54  ;;  %v4829_v16 = vadd.f32 %v2322_v12, %v6806_v55  ;;  %v1872_v17 = vpop.f32.mrb[21].mxu0  ;;  %v2324_v18 = vpop.f32.mrb[21].mxu1  ;;  %3366 = vmatprep.subr.bf16.mxu0 %v5611_v59  ;;  %3592 = vmatprep.subr.bf16.mxu1 %v5614_v1  ;;  %v5621_v1 = vld [vmem:[#allocation2 + $0x340] ss:$16 sps:$4 sm:$0xff]   ;;  %v5632_v11 = vld [vmem:[#allocation2 + $0x36c] ss:$16 sps:$4 sm:$0xff]  }
 0x225   :  { %v4798_v25 = vadd.f32 %v1872_v17, %v6810_v56  ;;  %v4830_v27 = vadd.f32 %v2324_v18, %v6814_v57  ;;  %v1874_v28 = vpop.f32.mrb[22].mxu0  ;;  %v2326_v29 = vpop.f32.mrb[22].mxu1  ;;  %3309 = vmatprep.mubr.bf16.mxu0 %v2432_v9  ;;  %3535 = vmatprep.mubr.bf16.mxu1 %v2432_v9  ;;  %v5629_v9 = vld [vmem:[#allocation2 + $0x364] ss:$16 sps:$4 sm:$0xff]  }
 0x226   :  { %v4799_v30 = vadd.f32 %v1874_v28, %v6802_v54  ;;  %v4831_v31 = vadd.f32 %v2326_v29, %v6806_v55  ;;  %v1876_v32 = vpop.f32.mrb[23].mxu0  ;;  %v2328_v33 = vpop.f32.mrb[23].mxu1  ;;  %3310 = vmatmul.mubr.bf16.gmra.mrb[48].mxu0 %v2431_v7  ;;  %3536 = vmatmul.mubr.bf16.gmra.mrb[48].mxu1 %v2431_v7  ;;  %v2391_v39 = vmax.f32 %v4797_v15, 0.0  ;;  %v2393_v41 = vmax.f32 %v4829_v16, 0.0  ;;  %v5630_v28 = vld [vmem:[#allocation2 + $0x368] ss:$16 sps:$4 sm:$0xff]  }
 0x227   :  { %v4800_v34 = vadd.f32 %v1876_v32, %v6810_v56  ;;  %v4832_v35 = vadd.f32 %v2328_v33, %v6814_v57  ;;  %3367 = vmatpush1.bf16.msra.mxu0 %v5609_v13  ;;  %3593 = vmatpush1.bf16.msra.mxu1 %v5612_v14  ;;  %v2392_v45 = vmax.f32 %v4798_v25, 0.0  ;;  %v2394_v46 = vmax.f32 %v4830_v27, 0.0  ;;  %v5627_v27 = vld [vmem:[#allocation2 + $0x360] ss:$16 sps:$4 sm:$0xff]   ;;  %v5635_v29 = vld [vmem:[#allocation2 + $0x384] ss:$16 sps:$4 sm:$0xff]  }
 0x228   :  { %v2395_v42 = vmax.f32 %v4799_v30, 0.0  ;;  %v2397_v43 = vmax.f32 %v4831_v31, 0.0  ;;  %3368 = vmatprep.subr.bf16.mxu0 %v5617_v20  ;;  %3594 = vmatprep.subr.bf16.mxu1 %v5620_v23 }
 0x229   :  { %v2396_v47 = vmax.f32 %v4800_v34, 0.0  ;;  %v2398_v51 = vmax.f32 %v4832_v35, 0.0  ;;  %v5638_v34 = vld [vmem:[#allocation2 + $0x38c] ss:$16 sps:$4 sm:$0xff]  }
 0x22a   :  { %v2435_v58 = vpack.c.bf16 %v2395_v42, %v2391_v39  ;;  %v6884_v59 = vpack.c.bf16 %v2397_v43, %v2393_v41 }
 0x22b   :  { %v2436_v60 = vpack.c.bf16 %v2396_v47, %v2392_v45  ;;  %v6886_v61 = vpack.c.bf16 %v2398_v51, %v2394_v46  ;;  %v1880_v62 = vpop.f32.mrb[24].mxu0  ;;  %v2332_v63 = vpop.f32.mrb[24].mxu1  ;;  %3369 = vmatpush1.bf16.msra.mxu0 %v5615_v36  ;;  %3595 = vmatpush1.bf16.msra.mxu1 %v5618_v37  ;;  %v5633_v46 = vld [vmem:[#allocation2 + $0x380] ss:$16 sps:$4 sm:$0xff]   ;;  %v5636_v47 = vld [vmem:[#allocation2 + $0x388] ss:$16 sps:$4 sm:$0xff]  }
 0x22c   :  { %v4801_v4 = vadd.f32 %v1880_v62, %v6802_v54  ;;  %v4833_v5 = vadd.f32 %v2332_v63, %v6806_v55  ;;  %v1882_v6 = vpop.f32.mrb[25].mxu0  ;;  %v2334_v7 = vpop.f32.mrb[25].mxu1  ;;  %3370 = vmatprep.subr.bf16.mxu0 %v5623_v22  ;;  %3596 = vmatprep.subr.bf16.mxu1 %v5626_v44  ;;  %v5641_v63 = vld [vmem:[#allocation2 + $0x3a4] ss:$16 sps:$4 sm:$0xff]  }
 0x22d   :  { %v4802_v12 = vadd.f32 %v1882_v6, %v6810_v56  ;;  %v4834_v13 = vadd.f32 %v2334_v7, %v6814_v57  ;;  %v1884_v14 = vpop.f32.mrb[26].mxu0  ;;  %v2336_v15 = vpop.f32.mrb[26].mxu1  ;;  %3319 = vmatprep.mubr.bf16.mxu0 %v2436_v60  ;;  %3545 = vmatprep.mubr.bf16.mxu1 %v2436_v60 }
 0x22e   :  { %v4803_v16 = vadd.f32 %v1884_v14, %v6802_v54  ;;  %v4835_v17 = vadd.f32 %v2336_v15, %v6806_v55  ;;  %v1886_v18 = vpop.f32.mrb[27].mxu0  ;;  %v2338_v20 = vpop.f32.mrb[27].mxu1  ;;  %3320 = vmatmul.mubr.bf16.gmra.mrb[52].mxu0 %v2435_v58  ;;  %3546 = vmatmul.mubr.bf16.gmra.mrb[52].mxu1 %v2435_v58  ;;  %v2399_v30 = vmax.f32 %v4801_v4, 0.0  ;;  %v2401_v31 = vmax.f32 %v4833_v5, 0.0  ;;  %v5639_v15 = vld [vmem:[#allocation2 + $0x3a0] ss:$16 sps:$4 sm:$0xff]  }
 0x22f   :  { %v4804_v23 = vadd.f32 %v1886_v18, %v6810_v56  ;;  %v4836_v25 = vadd.f32 %v2338_v20, %v6814_v57  ;;  %3371 = vmatpush1.bf16.msra.mxu0 %v5621_v1  ;;  %3597 = vmatpush1.bf16.msra.mxu1 %v5624_v3  ;;  %v2400_v35 = vmax.f32 %v4802_v12, 0.0  ;;  %v2402_v36 = vmax.f32 %v4834_v13, 0.0  ;;  %v5644_v1 = vld [vmem:[#allocation2 + $0x3ac] ss:$16 sps:$4 sm:$0xff]  }
 0x230   :  { %v2403_v32 = vmax.f32 %v4803_v16, 0.0  ;;  %v2405_v33 = vmax.f32 %v4835_v17, 0.0  ;;  %3372 = vmatprep.subr.bf16.mxu0 %v5629_v9  ;;  %3598 = vmatprep.subr.bf16.mxu1 %v5632_v11  ;;  %v5642_v16 = vld [vmem:[#allocation2 + $0x3a8] ss:$16 sps:$4 sm:$0xff]   ;;  %v5647_v17 = vld [vmem:[#allocation2 + $0x3c4] ss:$16 sps:$4 sm:$0xff]  }
 0x231   :  { %v2404_v37 = vmax.f32 %v4804_v23, 0.0  ;;  %v2406_v22 = vmax.f32 %v4836_v25, 0.0 }
 0x232   :  { %v2439_v39 = vpack.c.bf16 %v2403_v32, %v2399_v30  ;;  %v6896_v41 = vpack.c.bf16 %v2405_v33, %v2401_v31  ;;  %v5645_v32 = vld [vmem:[#allocation2 + $0x3c0] ss:$16 sps:$4 sm:$0xff]   ;;  %v5648_v33 = vld [vmem:[#allocation2 + $0x3c8] ss:$16 sps:$4 sm:$0xff]  }
 0x233   :  { %v2440_v42 = vpack.c.bf16 %v2404_v37, %v2400_v35  ;;  %v6898_v43 = vpack.c.bf16 %v2406_v22, %v2402_v36  ;;  %v1890_v44 = vpop.f32.mrb[28].mxu0  ;;  %v2342_v45 = vpop.f32.mrb[28].mxu1  ;;  %3373 = vmatpush1.bf16.msra.mxu0 %v5627_v27  ;;  %3599 = vmatpush1.bf16.msra.mxu1 %v5630_v28  ;;  %v5656_v35 = vld [vmem:[#allocation2 + $0x3ec] ss:$16 sps:$4 sm:$0xff]   ;;  %v5651_v36 = vld [vmem:[#allocation2 + $0x3e0] ss:$16 sps:$4 sm:$0xff]  }
 0x234   :  { %v4805_v51 = vadd.f32 %v1890_v44, %v6802_v54  ;;  %v4837_v58 = vadd.f32 %v2342_v45, %v6806_v55  ;;  %v1892_v60 = vpop.f32.mrb[29].mxu0  ;;  %v2344_v62 = vpop.f32.mrb[29].mxu1  ;;  %3374 = vmatprep.subr.bf16.mxu0 %v5635_v29  ;;  %3600 = vmatprep.subr.bf16.mxu1 %v5638_v34  ;;  %v5653_v34 = vld [vmem:[#allocation2 + $0x3e4] ss:$16 sps:$4 sm:$0xff]   ;;  %v5654_v37 = vld [vmem:[#allocation2 + $0x3e8] ss:$16 sps:$4 sm:$0xff]  }
 0x235   :  { %v4806_v3 = vadd.f32 %v1892_v60, %v6810_v56  ;;  %v4838_v4 = vadd.f32 %v2344_v62, %v6814_v57  ;;  %v1894_v5 = vpop.f32.mrb[30].mxu0  ;;  %v2346_v6 = vpop.f32.mrb[30].mxu1  ;;  %3329 = vmatprep.mubr.bf16.mxu0 %v2440_v42  ;;  %3555 = vmatprep.mubr.bf16.mxu1 %v2440_v42  ;;  %v5657_v22 = vld [vmem:[#allocation5 + $0x40] sm:$0xff]   ;;  %v5661_v45 = vld [vmem:[#allocation5 + $0x48] sm:$0xff]   ;;  %v5666_v60 = vld [vmem:[#allocation5 + $0x10] sm:$0xff]  }
 0x236   :  { %v4807_v7 = vadd.f32 %v1894_v5, %v6802_v54  ;;  %v4839_v9 = vadd.f32 %v2346_v6, %v6806_v55  ;;  %v1896_v11 = vpop.f32.mrb[31].mxu0  ;;  %v2348_v12 = vpop.f32.mrb[31].mxu1  ;;  %3330 = vmatmul.mubr.bf16.gmra.mrb[56].mxu0 %v2439_v39  ;;  %3556 = vmatmul.mubr.bf16.gmra.mrb[56].mxu1 %v2439_v39  ;;  %v2407_v18 = vmax.f32 %v4805_v51, 0.0  ;;  %v2409_v20 = vmax.f32 %v4837_v58, 0.0  ;;  %v5650_v54 = vld [vmem:[#allocation2 + $0x3cc] ss:$16 sps:$4 sm:$0xff]  }
 0x237   :  { %v4808_v13 = vadd.f32 %v1896_v11, %v6810_v56  ;;  %v4840_v14 = vadd.f32 %v2348_v12, %v6814_v57  ;;  %3375 = vmatpush1.bf16.msra.mxu0 %v5633_v46  ;;  %3601 = vmatpush1.bf16.msra.mxu1 %v5636_v47  ;;  %v2408_v55 = vmax.f32 %v4806_v3, 0.0  ;;  %v2410_v27 = vmax.f32 %v4838_v4, 0.0  ;;  %v5659_v39 = vld [vmem:[#allocation5 + $0xc0] sm:$0xff]   ;;  %v5663_v46 = vld [vmem:[#allocation5 + $0xc8] sm:$0xff]   ;;  %v5665_v51 = vld [vmem:[#allocation5 + $0x50] sm:$0xff]  }
 0x238   :  { %v2411_v23 = vmax.f32 %v4807_v7, 0.0  ;;  %v2413_v25 = vmax.f32 %v4839_v9, 0.0  ;;  %3376 = vmatprep.subr.bf16.mxu0 %v5641_v63  ;;  %3602 = vmatprep.subr.bf16.mxu1 %v5644_v1  ;;  %v5658_v42 = vld [vmem:[#allocation5] sm:$0xff]   ;;  %v5664_v47 = vld [vmem:[#allocation5 + $0x88] sm:$0xff]   ;;  %v5667_v58 = vld [vmem:[#allocation5 + $0xd0] sm:$0xff]  }
 0x239   :  { %v2412_v28 = vmax.f32 %v4808_v13, 0.0  ;;  %v2414_v29 = vmax.f32 %v4840_v14, 0.0  ;;  %v5660_v44 = vld [vmem:[#allocation5 + $0x80] sm:$0xff]   ;;  %v5668_v62 = vld [vmem:[#allocation5 + $0x90] sm:$0xff]   ;;  %v5669_v63 = vld [vmem:[#allocation5 + $0x58] sm:$0xff]  }
 0x23a   :  { %v2443_v30 = vpack.c.bf16 %v2411_v23, %v2407_v18  ;;  %v6908_v56 = vpack.c.bf16 %v2413_v25, %v2409_v20  ;;  %v5672_v1 = vld [vmem:[#allocation5 + $0x98] sm:$0xff]   ;;  %v5673_v3 = vld [vmem:[#allocation5 + $0x60] sm:$0xff]   ;;  %v5677_v7 = vld [vmem:[#allocation5 + $0x68] sm:$0xff]  }
 0x23b   :  { %v2444_v57 = vpack.c.bf16 %v2412_v28, %v2408_v55  ;;  %v6910_v31 = vpack.c.bf16 %v2414_v29, %v2410_v27  ;;  %3377 = vmatpush1.bf16.msra.mxu0 %v5639_v15  ;;  %3603 = vmatpush1.bf16.msra.mxu1 %v5642_v16  ;;  %v5675_v4 = vld [vmem:[#allocation5 + $0xe0] sm:$0xff]   ;;  %v5680_v9 = vld [vmem:[#allocation5 + $0xa8] sm:$0xff]   ;;  %v5681_v11 = vld [vmem:[#allocation5 + $0x70] sm:$0xff]  }
 0x23c   :  { %3378 = vmatprep.subr.bf16.mxu0 %v5647_v17  ;;  %3604 = vmatprep.subr.bf16.mxu1 %v5650_v54  ;;  %v5674_v5 = vld [vmem:[#allocation5 + $0x20] sm:$0xff]   ;;  %v5683_v12 = vld [vmem:[#allocation5 + $0xf0] sm:$0xff]  }
 0x23d   :  { %3339 = vmatprep.mubr.bf16.mxu0 %v2444_v57  ;;  %3565 = vmatprep.mubr.bf16.mxu1 %v2444_v57  ;;  %v5676_v6 = vld [vmem:[#allocation5 + $0xa0] sm:$0xff]   ;;  %v5682_v13 = vld [vmem:[#allocation5 + $0x30] sm:$0xff]  }
 0x23e   :  { %3340 = vmatmul.mubr.bf16.gmra.mrb[60].mxu0 %v2443_v30  ;;  %3566 = vmatmul.mubr.bf16.gmra.mrb[60].mxu1 %v2443_v30  ;;  %v5684_v14 = vld [vmem:[#allocation5 + $0xb0] sm:$0xff]  }
 0x23f   :  { %3379 = vmatpush1.bf16.msra.mxu0 %v5645_v32  ;;  %3382 = vmatprep.mubr.bf16.mxu0 %v6826_v21 }
 0x240   :  { %3605 = vmatpush1.bf16.msra.mxu1 %v5648_v33  ;;  %3608 = vmatprep.mubr.bf16.mxu1 %v6826_v21  ;;  %v5662_v21 = vld [vmem:[#allocation5 + $0x8] sm:$0xff]  }
 0x241   :  { %3380 = vmatprep.subr.bf16.mxu0 %v5653_v34  ;;  %3606 = vmatprep.subr.bf16.mxu1 %v5656_v35 }
 0x243   :  { %3381 = vmatpush1.bf16.msra.mxu0 %v5651_v36 }
 0x244   :  { %3607 = vmatpush1.bf16.msra.mxu1 %v5654_v37  ;;  %4649 = vmatprep.subr.bf16.mxu0 %v5657_v22 }
 0x245   :  { %4713 = vmatprep.subr.bf16.mxu1 %v5659_v39 }
 0x246   :  { %3383 = vmatmul.mubr.bf16.vlgmr.msra.gmra.mrb[32].mxu0 %v6824_v19 }
 0x247   :  { %3609 = vmatmul.mubr.bf16.vlgmr.msra.gmra.mrb[32].mxu1 %v6824_v19  ;;  %3392 = vmatprep.mubr.bf16.mxu0 %v6838_v2  ;;  %v5671_v19 = vld [vmem:[#allocation5 + $0xd8] sm:$0xff]  }
 0x248   :  { %3618 = vmatprep.mubr.bf16.mxu1 %v6838_v2  ;;  %4650 = vmatpush3.bf16.msra.mxu0 %v5658_v42  ;;  %v5670_v2 = vld [vmem:[#allocation5 + $0x18] sm:$0xff]  }
 0x249   :  { %4714 = vmatpush3.bf16.msra.mxu1 %v5660_v44  ;;  %4651 = vmatprep.subr.bf16.mxu0 %v5661_v45 }
 0x24a   :  { %4715 = vmatprep.subr.bf16.mxu1 %v5663_v46 }
 0x24c   :  { %4652 = vmatpush3.bf16.msra.mxu0 %v5662_v21 }
 0x24d   :  { %4716 = vmatpush3.bf16.msra.mxu1 %v5664_v47  ;;  %4653 = vmatprep.subr.bf16.mxu0 %v5665_v51 }
 0x24e   :  { %3393 = vmatmul.mubr.bf16.gmra.mrb[36].mxu0 %v6836_v0  ;;  %4717 = vmatprep.subr.bf16.mxu1 %v5667_v58 }
 0x24f   :  { %3619 = vmatmul.mubr.bf16.gmra.mrb[36].mxu1 %v6836_v0  ;;  %3402 = vmatprep.mubr.bf16.mxu0 %v6850_v40  ;;  %v5679_v0 = vld [vmem:[#allocation5 + $0xe8] sm:$0xff]  }
 0x250   :  { %3628 = vmatprep.mubr.bf16.mxu1 %v6850_v40  ;;  %4654 = vmatpush3.bf16.msra.mxu0 %v5666_v60  ;;  %v5678_v40 = vld [vmem:[#allocation5 + $0x28] sm:$0xff]  }
 0x251   :  { %4718 = vmatpush3.bf16.msra.mxu1 %v5668_v62  ;;  %4655 = vmatprep.subr.bf16.mxu0 %v5669_v63 }
 0x252   :  { %4719 = vmatprep.subr.bf16.mxu1 %v5671_v19 }
 0x254   :  { %4656 = vmatpush3.bf16.msra.mxu0 %v5670_v2 }
 0x255   :  { %4720 = vmatpush3.bf16.msra.mxu1 %v5672_v1  ;;  %4657 = vmatprep.subr.bf16.mxu0 %v5673_v3 }
 0x256   :  { %3403 = vmatmul.mubr.bf16.gmra.mrb[40].mxu0 %v6848_v38  ;;  %4721 = vmatprep.subr.bf16.mxu1 %v5675_v4 }
 0x257   :  { %3629 = vmatmul.mubr.bf16.gmra.mrb[40].mxu1 %v6848_v38  ;;  %3412 = vmatprep.mubr.bf16.mxu0 %v6862_v26  ;;  %v5685_v38 = vld [vmem:[#allocation5 + $0x78] sm:$0xff]  }
 0x258   :  { %3638 = vmatprep.mubr.bf16.mxu1 %v6862_v26  ;;  %4658 = vmatpush3.bf16.msra.mxu0 %v5674_v5  ;;  %v5686_v26 = vld [vmem:[#allocation5 + $0x38] sm:$0xff]  }
 0x259   :  { %4722 = vmatpush3.bf16.msra.mxu1 %v5676_v6  ;;  %4659 = vmatprep.subr.bf16.mxu0 %v5677_v7 }
 0x25a   :  { %4723 = vmatprep.subr.bf16.mxu1 %v5679_v0 }
 0x25c   :  { %4660 = vmatpush3.bf16.msra.mxu0 %v5678_v40 }
 0x25d   :  { %4724 = vmatpush3.bf16.msra.mxu1 %v5680_v9  ;;  %4661 = vmatprep.subr.bf16.mxu0 %v5681_v11 }
 0x25e   :  { %3413 = vmatmul.mubr.bf16.gmra.mrb[44].mxu0 %v6860_v24  ;;  %4725 = vmatprep.subr.bf16.mxu1 %v5683_v12 }
 0x25f   :  { %3639 = vmatmul.mubr.bf16.gmra.mrb[44].mxu1 %v6860_v24  ;;  %3422 = vmatprep.mubr.bf16.mxu0 %v6874_v10  ;;  %v5687_v24 = vld [vmem:[#allocation5 + $0xf8] sm:$0xff]  }
 0x260   :  { %3648 = vmatprep.mubr.bf16.mxu1 %v6874_v10  ;;  %4662 = vmatpush3.bf16.msra.mxu0 %v5682_v13  ;;  %v2575_v10 = vld [vmem:[%s7064_s4] sm:$0xf] }
 0x261   :  { %4726 = vmatpush3.bf16.msra.mxu1 %v5684_v14  ;;  %4663 = vmatprep.subr.bf16.mxu0 %v5685_v38 }
 0x262   :  { %4727 = vmatprep.subr.bf16.mxu1 %v5687_v24 }
 0x264   :  { %4664 = vmatpush3.bf16.msra.mxu0 %v5686_v26 }
 0x266   :  { %3423 = vmatmul.mubr.bf16.gmra.mrb[48].mxu0 %v6872_v8 }
 0x267   :  { %3649 = vmatmul.mubr.bf16.gmra.mrb[48].mxu1 %v6872_v8  ;;  %3432 = vmatprep.mubr.bf16.mxu0 %v6886_v61  ;;  %v5688_v8 = vld [vmem:[#allocation5 + $0xb8] sm:$0xff]  }
 0x268   :  { %3658 = vmatprep.mubr.bf16.mxu1 %v6886_v61  ;;  %4728 = vmatpush3.bf16.msra.mxu1 %v5688_v8  ;;  %v6953_v61 = vrot.slane %v2575_v10, %v432_v50 }
 0x26e   :  { %3433 = vmatmul.mubr.bf16.gmra.mrb[52].mxu0 %v6884_v59 }
 0x26f   :  { %3659 = vmatmul.mubr.bf16.gmra.mrb[52].mxu1 %v6884_v59  ;;  %3442 = vmatprep.mubr.bf16.mxu0 %v6898_v43  ;;  %v6949_v59 = vrot.slane %v2575_v10, %v424_v49 }
 0x270   :  { %3668 = vmatprep.mubr.bf16.mxu1 %v6898_v43  ;;  %v6961_v43 = vrot.slane %v2575_v10, %v436_v53 }
 0x276   :  { %3443 = vmatmul.mubr.bf16.gmra.mrb[56].mxu0 %v6896_v41 }
 0x277   :  { %3669 = vmatmul.mubr.bf16.gmra.mrb[56].mxu1 %v6896_v41  ;;  %3452 = vmatprep.mubr.bf16.mxu0 %v6910_v31  ;;  %v6957_v41 = vrot.slane %v2575_v10, %v428_v52 }
 0x278   :  { %3678 = vmatprep.mubr.bf16.mxu1 %v6910_v31 }
 0x27e   :  { %3453 = vmatmul.mubr.bf16.gmra.mrb[60].mxu0 %v6908_v56 }
 0x27f   :  { %3679 = vmatmul.mubr.bf16.gmra.mrb[60].mxu1 %v6908_v56 }
 0x319   :  { %v3384_v15 = vpop.f32.mrb[32].mxu0 }
 0x31a   :  { %v4841_v16 = vadd.f32 %v3384_v15, %v6949_v59  ;;  %v3610_v17 = vpop.f32.mrb[32].mxu1  ;;  %v3386_v18 = vpop.f32.mrb[33].mxu0 }
 0x31b   :  { %v4873_v49 = vadd.f32 %v3610_v17, %v6953_v61  ;;  %v4842_v20 = vadd.f32 %v3386_v18, %v6957_v41  ;;  %v3612_v23 = vpop.f32.mrb[33].mxu1  ;;  %v3388_v50 = vpop.f32.mrb[34].mxu0 }
 0x31c   :  { %v4874_v25 = vadd.f32 %v3612_v23, %v6961_v43  ;;  %v4843_v52 = vadd.f32 %v3388_v50, %v6949_v59  ;;  %v3614_v54 = vpop.f32.mrb[34].mxu1  ;;  %v3390_v55 = vpop.f32.mrb[35].mxu0  ;;  %v3689_v28 = vmax.f32 %v4841_v16, 0.0 }
 0x31d   :  { %v4875_v48 = vadd.f32 %v3614_v54, %v6953_v61  ;;  %v4844_v53 = vadd.f32 %v3390_v55, %v6957_v41  ;;  %v3616_v27 = vpop.f32.mrb[35].mxu1  ;;  %v3691_v56 = vmax.f32 %v4873_v49, 0.0  ;;  %v3690_v57 = vmax.f32 %v4842_v20, 0.0 }
 0x31e   :  { %v3693_v29 = vmax.f32 %v4843_v52, 0.0  ;;  %v4876_v30 = vadd.f32 %v3616_v27, %v6961_v43  ;;  %v3692_v33 = vmax.f32 %v4874_v25, 0.0 }
 0x31f   :  { %v3695_v31 = vmax.f32 %v4875_v48, 0.0  ;;  %v3694_v32 = vmax.f32 %v4844_v53, 0.0 }
 0x320   :  { %v3753_v34 = vpack.c.bf16 %v3693_v29, %v3689_v28  ;;  %v3696_v35 = vmax.f32 %v4876_v30, 0.0 }
 0x321   :  { %v3755_v36 = vpack.c.bf16 %v3695_v31, %v3691_v56  ;;  %v3754_v37 = vpack.c.bf16 %v3694_v32, %v3690_v57  ;;  %v3394_v22 = vpop.f32.mrb[36].mxu0 }
 0x322   :  { %v3756_v39 = vpack.c.bf16 %v3696_v35, %v3692_v33  ;;  %v4845_v42 = vadd.f32 %v3394_v22, %v6949_v59  ;;  %v3620_v44 = vpop.f32.mrb[36].mxu1  ;;  %v3396_v45 = vpop.f32.mrb[37].mxu0 }
 0x323   :  { %v4877_v46 = vadd.f32 %v3620_v44, %v6953_v61  ;;  %v4846_v21 = vadd.f32 %v3396_v45, %v6957_v41  ;;  %v3622_v47 = vpop.f32.mrb[37].mxu1  ;;  %v3398_v51 = vpop.f32.mrb[38].mxu0  ;;  %4080 = vmatprep.mubr.bf16.mxu0 %v3754_v37 }
 0x324   :  { %v4878_v58 = vadd.f32 %v3622_v47, %v6961_v43  ;;  %v4847_v60 = vadd.f32 %v3398_v51, %v6949_v59  ;;  %v3624_v62 = vpop.f32.mrb[38].mxu1  ;;  %4177 = vmatprep.mubr.bf16.mxu1 %v3756_v39  ;;  %v3400_v63 = vpop.f32.mrb[39].mxu0  ;;  %4081 = vmatmul.mubr.bf16.vlgmr.msra.gmra.mrb[64].mxu0 %v3753_v34  ;;  %v3697_v3 = vmax.f32 %v4845_v42, 0.0 }
 0x325   :  { %v4879_v19 = vadd.f32 %v3624_v62, %v6953_v61  ;;  %v4848_v2 = vadd.f32 %v3400_v63, %v6957_v41  ;;  %v3626_v1 = vpop.f32.mrb[39].mxu1  ;;  %4178 = vmatmul.mubr.bf16.vlgmr.msra.gmra.mrb[64].mxu1 %v3755_v36  ;;  %v3699_v6 = vmax.f32 %v4877_v46, 0.0  ;;  %v3698_v7 = vmax.f32 %v4846_v21, 0.0 }
 0x326   :  { %v3701_v4 = vmax.f32 %v4847_v60, 0.0  ;;  %v4880_v5 = vadd.f32 %v3626_v1, %v6961_v43  ;;  %v3700_v9 = vmax.f32 %v4878_v58, 0.0 }
 0x327   :  { %v3703_v0 = vmax.f32 %v4879_v19, 0.0  ;;  %v3702_v40 = vmax.f32 %v4848_v2, 0.0 }
 0x328   :  { %v3757_v11 = vpack.c.bf16 %v3701_v4, %v3697_v3  ;;  %v3704_v12 = vmax.f32 %v4880_v5, 0.0 }
 0x329   :  { %v3759_v13 = vpack.c.bf16 %v3703_v0, %v3699_v6  ;;  %v3758_v14 = vpack.c.bf16 %v3702_v40, %v3698_v7  ;;  %v3404_v38 = vpop.f32.mrb[40].mxu0 }
 0x32a   :  { %v3760_v24 = vpack.c.bf16 %v3704_v12, %v3700_v9  ;;  %v4849_v26 = vadd.f32 %v3404_v38, %v6949_v59  ;;  %v3630_v8 = vpop.f32.mrb[40].mxu1  ;;  %v3406_v10 = vpop.f32.mrb[41].mxu0 }
 0x32b   :  { %v4881_v15 = vadd.f32 %v3630_v8, %v6953_v61  ;;  %v4850_v16 = vadd.f32 %v3406_v10, %v6957_v41  ;;  %v3632_v17 = vpop.f32.mrb[41].mxu1  ;;  %v3408_v18 = vpop.f32.mrb[42].mxu0  ;;  %4088 = vmatprep.mubr.bf16.mxu0 %v3758_v14 }
 0x32c   :  { %v4882_v49 = vadd.f32 %v3632_v17, %v6961_v43  ;;  %v4851_v20 = vadd.f32 %v3408_v18, %v6949_v59  ;;  %v3634_v23 = vpop.f32.mrb[42].mxu1  ;;  %4185 = vmatprep.mubr.bf16.mxu1 %v3760_v24  ;;  %v3410_v50 = vpop.f32.mrb[43].mxu0  ;;  %4089 = vmatmul.mubr.bf16.gmra.mrb[68].mxu0 %v3757_v11  ;;  %v3705_v55 = vmax.f32 %v4849_v26, 0.0 }
 0x32d   :  { %v4883_v25 = vadd.f32 %v3634_v23, %v6953_v61  ;;  %v4852_v52 = vadd.f32 %v3410_v50, %v6957_v41  ;;  %v3636_v54 = vpop.f32.mrb[43].mxu1  ;;  %4186 = vmatmul.mubr.bf16.gmra.mrb[68].mxu1 %v3759_v13  ;;  %v3707_v27 = vmax.f32 %v4881_v15, 0.0  ;;  %v3706_v28 = vmax.f32 %v4850_v16, 0.0 }
 0x32e   :  { %v3709_v48 = vmax.f32 %v4851_v20, 0.0  ;;  %v4884_v53 = vadd.f32 %v3636_v54, %v6961_v43  ;;  %v3708_v56 = vmax.f32 %v4882_v49, 0.0 }
 0x32f   :  { %v3711_v29 = vmax.f32 %v4883_v25, 0.0  ;;  %v3710_v30 = vmax.f32 %v4852_v52, 0.0 }
 0x330   :  { %v3761_v57 = vpack.c.bf16 %v3709_v48, %v3705_v55  ;;  %v3712_v31 = vmax.f32 %v4884_v53, 0.0 }
 0x331   :  { %v3763_v32 = vpack.c.bf16 %v3711_v29, %v3707_v27  ;;  %v3762_v33 = vpack.c.bf16 %v3710_v30, %v3706_v28  ;;  %v3414_v34 = vpop.f32.mrb[44].mxu0 }
 0x332   :  { %v3764_v35 = vpack.c.bf16 %v3712_v31, %v3708_v56  ;;  %v4853_v36 = vadd.f32 %v3414_v34, %v6949_v59  ;;  %v3640_v37 = vpop.f32.mrb[44].mxu1  ;;  %v3416_v22 = vpop.f32.mrb[45].mxu0 }
 0x333   :  { %v4885_v39 = vadd.f32 %v3640_v37, %v6953_v61  ;;  %v4854_v42 = vadd.f32 %v3416_v22, %v6957_v41  ;;  %v3642_v44 = vpop.f32.mrb[45].mxu1  ;;  %v3418_v45 = vpop.f32.mrb[46].mxu0  ;;  %4096 = vmatprep.mubr.bf16.mxu0 %v3762_v33 }
 0x334   :  { %v4886_v46 = vadd.f32 %v3642_v44, %v6961_v43  ;;  %v4855_v21 = vadd.f32 %v3418_v45, %v6949_v59  ;;  %v3644_v47 = vpop.f32.mrb[46].mxu1  ;;  %4193 = vmatprep.mubr.bf16.mxu1 %v3764_v35  ;;  %v3420_v51 = vpop.f32.mrb[47].mxu0  ;;  %4097 = vmatmul.mubr.bf16.gmra.mrb[72].mxu0 %v3761_v57  ;;  %v3713_v63 = vmax.f32 %v4853_v36, 0.0 }
 0x335   :  { %v4887_v58 = vadd.f32 %v3644_v47, %v6953_v61  ;;  %v4856_v60 = vadd.f32 %v3420_v51, %v6957_v41  ;;  %v3646_v62 = vpop.f32.mrb[47].mxu1  ;;  %4194 = vmatmul.mubr.bf16.gmra.mrb[72].mxu1 %v3763_v32  ;;  %v3715_v1 = vmax.f32 %v4885_v39, 0.0  ;;  %v3714_v3 = vmax.f32 %v4854_v42, 0.0 }
 0x336   :  { %v3717_v19 = vmax.f32 %v4855_v21, 0.0  ;;  %v4888_v2 = vadd.f32 %v3646_v62, %v6961_v43  ;;  %v3716_v6 = vmax.f32 %v4886_v46, 0.0 }
 0x337   :  { %v3719_v4 = vmax.f32 %v4887_v58, 0.0  ;;  %v3718_v5 = vmax.f32 %v4856_v60, 0.0 }
 0x338   :  { %v3765_v7 = vpack.c.bf16 %v3717_v19, %v3713_v63  ;;  %v3720_v0 = vmax.f32 %v4888_v2, 0.0 }
 0x339   :  { %v3767_v40 = vpack.c.bf16 %v3719_v4, %v3715_v1  ;;  %v3766_v9 = vpack.c.bf16 %v3718_v5, %v3714_v3  ;;  %v3424_v11 = vpop.f32.mrb[48].mxu0 }
 0x33a   :  { %v3768_v12 = vpack.c.bf16 %v3720_v0, %v3716_v6  ;;  %v4857_v13 = vadd.f32 %v3424_v11, %v6949_v59  ;;  %v3650_v14 = vpop.f32.mrb[48].mxu1  ;;  %v3426_v38 = vpop.f32.mrb[49].mxu0 }
 0x33b   :  { %v4889_v24 = vadd.f32 %v3650_v14, %v6953_v61  ;;  %v4858_v26 = vadd.f32 %v3426_v38, %v6957_v41  ;;  %v3652_v8 = vpop.f32.mrb[49].mxu1  ;;  %v3428_v10 = vpop.f32.mrb[50].mxu0  ;;  %4104 = vmatprep.mubr.bf16.mxu0 %v3766_v9 }
 0x33c   :  { %v4890_v15 = vadd.f32 %v3652_v8, %v6961_v43  ;;  %v4859_v16 = vadd.f32 %v3428_v10, %v6949_v59  ;;  %v3654_v17 = vpop.f32.mrb[50].mxu1  ;;  %4201 = vmatprep.mubr.bf16.mxu1 %v3768_v12  ;;  %v3430_v18 = vpop.f32.mrb[51].mxu0  ;;  %4105 = vmatmul.mubr.bf16.gmra.mrb[76].mxu0 %v3765_v7  ;;  %v3721_v50 = vmax.f32 %v4857_v13, 0.0 }
 0x33d   :  { %v4891_v49 = vadd.f32 %v3654_v17, %v6953_v61  ;;  %v4860_v20 = vadd.f32 %v3430_v18, %v6957_v41  ;;  %v3656_v23 = vpop.f32.mrb[51].mxu1  ;;  %4202 = vmatmul.mubr.bf16.gmra.mrb[76].mxu1 %v3767_v40  ;;  %v3723_v54 = vmax.f32 %v4889_v24, 0.0  ;;  %v3722_v55 = vmax.f32 %v4858_v26, 0.0 }
 0x33e   :  { %v3725_v25 = vmax.f32 %v4859_v16, 0.0  ;;  %v4892_v52 = vadd.f32 %v3656_v23, %v6961_v43  ;;  %v3724_v27 = vmax.f32 %v4890_v15, 0.0 }
 0x33f   :  { %v3727_v48 = vmax.f32 %v4891_v49, 0.0  ;;  %v3726_v53 = vmax.f32 %v4860_v20, 0.0 }
 0x340   :  { %v3769_v28 = vpack.c.bf16 %v3725_v25, %v3721_v50  ;;  %v3728_v29 = vmax.f32 %v4892_v52, 0.0 }
 0x341   :  { %v3771_v30 = vpack.c.bf16 %v3727_v48, %v3723_v54  ;;  %v3770_v56 = vpack.c.bf16 %v3726_v53, %v3722_v55  ;;  %v3434_v57 = vpop.f32.mrb[52].mxu0 }
 0x342   :  { %v3772_v31 = vpack.c.bf16 %v3728_v29, %v3724_v27  ;;  %v4861_v32 = vadd.f32 %v3434_v57, %v6949_v59  ;;  %v3660_v33 = vpop.f32.mrb[52].mxu1  ;;  %v3436_v34 = vpop.f32.mrb[53].mxu0 }
 0x343   :  { %v4893_v35 = vadd.f32 %v3660_v33, %v6953_v61  ;;  %v4862_v36 = vadd.f32 %v3436_v34, %v6957_v41  ;;  %v3662_v37 = vpop.f32.mrb[53].mxu1  ;;  %v3438_v22 = vpop.f32.mrb[54].mxu0  ;;  %4112 = vmatprep.mubr.bf16.mxu0 %v3770_v56 }
 0x344   :  { %v4894_v39 = vadd.f32 %v3662_v37, %v6961_v43  ;;  %v4863_v42 = vadd.f32 %v3438_v22, %v6949_v59  ;;  %v3664_v44 = vpop.f32.mrb[54].mxu1  ;;  %4209 = vmatprep.mubr.bf16.mxu1 %v3772_v31  ;;  %v3440_v45 = vpop.f32.mrb[55].mxu0  ;;  %4113 = vmatmul.mubr.bf16.gmra.mrb[80].mxu0 %v3769_v28  ;;  %v3729_v51 = vmax.f32 %v4861_v32, 0.0 }
 0x345   :  { %v4895_v46 = vadd.f32 %v3664_v44, %v6953_v61  ;;  %v4864_v21 = vadd.f32 %v3440_v45, %v6957_v41  ;;  %v3666_v47 = vpop.f32.mrb[55].mxu1  ;;  %4210 = vmatmul.mubr.bf16.gmra.mrb[80].mxu1 %v3771_v30  ;;  %v3731_v62 = vmax.f32 %v4893_v35, 0.0  ;;  %v3730_v63 = vmax.f32 %v4862_v36, 0.0 }
 0x346   :  { %v3733_v58 = vmax.f32 %v4863_v42, 0.0  ;;  %v4896_v60 = vadd.f32 %v3666_v47, %v6961_v43  ;;  %v3732_v1 = vmax.f32 %v4894_v39, 0.0 }
 0x347   :  { %v3735_v19 = vmax.f32 %v4895_v46, 0.0  ;;  %v3734_v2 = vmax.f32 %v4864_v21, 0.0 }
 0x348   :  { %v3773_v3 = vpack.c.bf16 %v3733_v58, %v3729_v51  ;;  %v3736_v4 = vmax.f32 %v4896_v60, 0.0 }
 0x349   :  { %v3775_v5 = vpack.c.bf16 %v3735_v19, %v3731_v62  ;;  %v3774_v6 = vpack.c.bf16 %v3734_v2, %v3730_v63  ;;  %v3444_v7 = vpop.f32.mrb[56].mxu0 }
 0x34a   :  { %v3776_v0 = vpack.c.bf16 %v3736_v4, %v3732_v1  ;;  %v4865_v40 = vadd.f32 %v3444_v7, %v6949_v59  ;;  %v3670_v9 = vpop.f32.mrb[56].mxu1  ;;  %v3446_v11 = vpop.f32.mrb[57].mxu0 }
 0x34b   :  { %v4897_v12 = vadd.f32 %v3670_v9, %v6953_v61  ;;  %v4866_v13 = vadd.f32 %v3446_v11, %v6957_v41  ;;  %v3672_v14 = vpop.f32.mrb[57].mxu1  ;;  %v3448_v38 = vpop.f32.mrb[58].mxu0  ;;  %4120 = vmatprep.mubr.bf16.mxu0 %v3774_v6 }
 0x34c   :  { %v4898_v24 = vadd.f32 %v3672_v14, %v6961_v43  ;;  %v4867_v26 = vadd.f32 %v3448_v38, %v6949_v59  ;;  %v3674_v8 = vpop.f32.mrb[58].mxu1  ;;  %4217 = vmatprep.mubr.bf16.mxu1 %v3776_v0  ;;  %v3450_v10 = vpop.f32.mrb[59].mxu0  ;;  %4121 = vmatmul.mubr.bf16.gmra.mrb[84].mxu0 %v3773_v3  ;;  %v3737_v18 = vmax.f32 %v4865_v40, 0.0 }
 0x34d   :  { %v4899_v15 = vadd.f32 %v3674_v8, %v6953_v61  ;;  %v4868_v16 = vadd.f32 %v3450_v10, %v6957_v41  ;;  %v3676_v17 = vpop.f32.mrb[59].mxu1  ;;  %4218 = vmatmul.mubr.bf16.gmra.mrb[84].mxu1 %v3775_v5  ;;  %v3739_v23 = vmax.f32 %v4897_v12, 0.0  ;;  %v3738_v50 = vmax.f32 %v4866_v13, 0.0 }
 0x34e   :  { %v3741_v49 = vmax.f32 %v4867_v26, 0.0  ;;  %v4900_v20 = vadd.f32 %v3676_v17, %v6961_v43  ;;  %v3740_v54 = vmax.f32 %v4898_v24, 0.0 }
 0x34f   :  { %v3743_v25 = vmax.f32 %v4899_v15, 0.0  ;;  %v3742_v52 = vmax.f32 %v4868_v16, 0.0 }
 0x350   :  { %v3777_v55 = vpack.c.bf16 %v3741_v49, %v3737_v18  ;;  %v3744_v48 = vmax.f32 %v4900_v20, 0.0 }
 0x351   :  { %v3779_v53 = vpack.c.bf16 %v3743_v25, %v3739_v23  ;;  %v3778_v27 = vpack.c.bf16 %v3742_v52, %v3738_v50  ;;  %v3454_v28 = vpop.f32.mrb[60].mxu0 }
 0x352   :  { %v3780_v29 = vpack.c.bf16 %v3744_v48, %v3740_v54  ;;  %v4869_v30 = vadd.f32 %v3454_v28, %v6949_v59  ;;  %v3680_v56 = vpop.f32.mrb[60].mxu1  ;;  %v3456_v57 = vpop.f32.mrb[61].mxu0 }
 0x353   :  { %v4901_v31 = vadd.f32 %v3680_v56, %v6953_v61  ;;  %v4870_v32 = vadd.f32 %v3456_v57, %v6957_v41  ;;  %v3682_v33 = vpop.f32.mrb[61].mxu1  ;;  %v3458_v34 = vpop.f32.mrb[62].mxu0  ;;  %4128 = vmatprep.mubr.bf16.mxu0 %v3778_v27 }
 0x354   :  { %v4902_v35 = vadd.f32 %v3682_v33, %v6961_v43  ;;  %v4871_v36 = vadd.f32 %v3458_v34, %v6949_v59  ;;  %v3684_v37 = vpop.f32.mrb[62].mxu1  ;;  %4225 = vmatprep.mubr.bf16.mxu1 %v3780_v29  ;;  %v3460_v22 = vpop.f32.mrb[63].mxu0  ;;  %4129 = vmatmul.mubr.bf16.gmra.mrb[88].mxu0 %v3777_v55  ;;  %v3745_v45 = vmax.f32 %v4869_v30, 0.0 }
 0x355   :  { %v4903_v39 = vadd.f32 %v3684_v37, %v6953_v61  ;;  %v4872_v42 = vadd.f32 %v3460_v22, %v6957_v41  ;;  %v3686_v44 = vpop.f32.mrb[63].mxu1  ;;  %4226 = vmatmul.mubr.bf16.gmra.mrb[88].mxu1 %v3779_v53  ;;  %v3747_v47 = vmax.f32 %v4901_v31, 0.0  ;;  %v3746_v51 = vmax.f32 %v4870_v32, 0.0 }
 0x356   :  { %v3749_v46 = vmax.f32 %v4871_v36, 0.0  ;;  %v4904_v21 = vadd.f32 %v3686_v44, %v6961_v43  ;;  %v3748_v62 = vmax.f32 %v4902_v35, 0.0  ;;  %v7030_v43 = vld [vmem:[%s7066_s6] ss:$0 sm:$0xff]  ;;  %s5768_s6 = smov [#allocation7]  }
 0x357   :  { %v3751_v58 = vmax.f32 %v4903_v39, 0.0  ;;  %v3750_v60 = vmax.f32 %v4872_v42, 0.0  ;;  %s4263_s19 = sshll.u32 %s5768_s6, 4  ;;  %s4264_s19 = int_to_ptr.vmem [resolvable:$true] %s4263_s19 }
 0x358   :  { %v3781_v59 = vpack.c.bf16 %v3749_v46, %v3745_v45  ;;  %v3752_v63 = vmax.f32 %v4904_v21, 0.0  ;;  %s5733_s20 = scalar_lea.vmem %s4264_s19, 2048  ;;  %p5738_p3 = scmp.lt.s32.totalorder %s4264_s19, %s4264_s19 }
 0x359   :  { %v3783_v19 = vpack.c.bf16 %v3751_v58, %v3747_v47  ;;  %v3782_v2 = vpack.c.bf16 %v3750_v60, %v3746_v51  ;;  %p5734_p2 = scmp.ne.s32.totalorder %s4264_s19, %s5733_s20  ;;  %p5739_p4 = scmp.lt.s32.totalorder %s5733_s20, %s5733_s20 }
 0x35a   :  { %v3784_v1 = vpack.c.bf16 %v3752_v63, %v3748_v62 }
 0x35b   :  { %4136 = vmatprep.mubr.bf16.mxu0 %v3782_v2  ;;  %p5740_p5 = por %p5739_p4, %p5738_p3 }
 0x35c   :  { %4233 = vmatprep.mubr.bf16.mxu1 %v3784_v1  ;;  %4137 = vmatmul.mubr.bf16.gmra.mrb[92].mxu0 %v3781_v59 }
 0x35d   :  { %4234 = vmatmul.mubr.bf16.gmra.mrb[92].mxu1 %v3783_v19  ;;  %p5741_p6 = pnand %p5740_p5, %p5734_p2 }
 0x3f7   :  { %v4665_v61 = vpop.f32.mrb[64].mxu0 }
 0x3f8   :  { %v4729_v41 = vpop.f32.mrb[64].mxu1  ;;  %v4666_v3 = vpop.f32.mrb[65].mxu0 }
 0x3f9   :  { %v4667_v4 = vadd.f32 %v4666_v3, %v4665_v61  ;;  %v4730_v5 = vpop.f32.mrb[65].mxu1  ;;  %v4668_v6 = vpop.f32.mrb[66].mxu0 }
 0x3fa   :  { %v4731_v7 = vadd.f32 %v4730_v5, %v4729_v41  ;;  %v4732_v0 = vpop.f32.mrb[66].mxu1  ;;  %v4669_v40 = vpop.f32.mrb[67].mxu0 }
 0x3fb   :  { %v4083_v9 = vadd.f32 %v4667_v4, %v7030_v43  ;;  %v4670_v11 = vadd.f32 %v4669_v40, %v4668_v6  ;;  %v4733_v12 = vpop.f32.mrb[67].mxu1 }
 0x3fc   :  { %v4734_v13 = vadd.f32 %v4733_v12, %v4732_v0 }
 0x3fd   :  { %v4180_v14 = vadd.f32 %v4731_v7, %v4083_v9  ;;  %v4086_v38 = vadd.f32 %v4670_v11, %v7030_v43 }
 0x3ff   :  { %4242 = vst [vmem:[#allocation7] sm:$0xff] %v4180_v14  ;;  %v4183_v24 = vadd.f32 %v4734_v13, %v4086_v38  ;;  %v4671_v26 = vpop.f32.mrb[68].mxu0 }
 0x400   :  { %v4735_v8 = vpop.f32.mrb[68].mxu1  ;;  %v4672_v10 = vpop.f32.mrb[69].mxu0 }
 0x401   :  { %4243 = vst [vmem:[#allocation7 + $0x8] sm:$0xff] %v4183_v24  ;;  %v4673_v15 = vadd.f32 %v4672_v10, %v4671_v26  ;;  %v4736_v16 = vpop.f32.mrb[69].mxu1  ;;  %v4674_v17 = vpop.f32.mrb[70].mxu0 }
 0x402   :  { %v4737_v18 = vadd.f32 %v4736_v16, %v4735_v8  ;;  %v4738_v49 = vpop.f32.mrb[70].mxu1  ;;  %v4675_v20 = vpop.f32.mrb[71].mxu0 }
 0x403   :  { %v4091_v23 = vadd.f32 %v4673_v15, %v7030_v43  ;;  %v4676_v50 = vadd.f32 %v4675_v20, %v4674_v17  ;;  %v4739_v25 = vpop.f32.mrb[71].mxu1 }
 0x404   :  { %v4740_v52 = vadd.f32 %v4739_v25, %v4738_v49 }
 0x405   :  { %v4188_v54 = vadd.f32 %v4737_v18, %v4091_v23  ;;  %v4094_v55 = vadd.f32 %v4676_v50, %v7030_v43 }
 0x407   :  { %4244 = vst [vmem:[#allocation7 + $0x10] sm:$0xff] %v4188_v54  ;;  %v4191_v48 = vadd.f32 %v4740_v52, %v4094_v55  ;;  %v4677_v53 = vpop.f32.mrb[72].mxu0 }
 0x408   :  { %v4741_v27 = vpop.f32.mrb[72].mxu1  ;;  %v4678_v28 = vpop.f32.mrb[73].mxu0 }
 0x409   :  { %4245 = vst [vmem:[#allocation7 + $0x18] sm:$0xff] %v4191_v48  ;;  %v4679_v29 = vadd.f32 %v4678_v28, %v4677_v53  ;;  %v4742_v30 = vpop.f32.mrb[73].mxu1  ;;  %v4680_v56 = vpop.f32.mrb[74].mxu0 }
 0x40a   :  { %v4743_v57 = vadd.f32 %v4742_v30, %v4741_v27  ;;  %v4744_v31 = vpop.f32.mrb[74].mxu1  ;;  %v4681_v32 = vpop.f32.mrb[75].mxu0 }
 0x40b   :  { %v4099_v33 = vadd.f32 %v4679_v29, %v7030_v43  ;;  %v4682_v34 = vadd.f32 %v4681_v32, %v4680_v56  ;;  %v4745_v35 = vpop.f32.mrb[75].mxu1 }
 0x40c   :  { %v4746_v36 = vadd.f32 %v4745_v35, %v4744_v31 }
 0x40d   :  { %v4196_v37 = vadd.f32 %v4743_v57, %v4099_v33  ;;  %v4102_v22 = vadd.f32 %v4682_v34, %v7030_v43 }
 0x40f   :  { %4246 = vst [vmem:[#allocation7 + $0x20] sm:$0xff] %v4196_v37  ;;  %v4199_v39 = vadd.f32 %v4746_v36, %v4102_v22  ;;  %v4683_v42 = vpop.f32.mrb[76].mxu0 }
 0x410   :  { %v4747_v44 = vpop.f32.mrb[76].mxu1  ;;  %v4684_v45 = vpop.f32.mrb[77].mxu0 }
 0x411   :  { %4247 = vst [vmem:[#allocation7 + $0x28] sm:$0xff] %v4199_v39  ;;  %v4685_v46 = vadd.f32 %v4684_v45, %v4683_v42  ;;  %v4748_v21 = vpop.f32.mrb[77].mxu1  ;;  %v4686_v47 = vpop.f32.mrb[78].mxu0 }
 0x412   :  { %v4749_v51 = vadd.f32 %v4748_v21, %v4747_v44  ;;  %v4750_v58 = vpop.f32.mrb[78].mxu1  ;;  %v4687_v60 = vpop.f32.mrb[79].mxu0 }
 0x413   :  { %v4107_v62 = vadd.f32 %v4685_v46, %v7030_v43  ;;  %v4688_v59 = vadd.f32 %v4687_v60, %v4686_v47  ;;  %v4751_v63 = vpop.f32.mrb[79].mxu1 }
 0x414   :  { %v4752_v19 = vadd.f32 %v4751_v63, %v4750_v58 }
 0x415   :  { %v4204_v2 = vadd.f32 %v4749_v51, %v4107_v62  ;;  %v4110_v1 = vadd.f32 %v4688_v59, %v7030_v43 }
 0x417   :  { %4248 = vst [vmem:[#allocation7 + $0x30] sm:$0xff] %v4204_v2  ;;  %v4207_v61 = vadd.f32 %v4752_v19, %v4110_v1  ;;  %v4689_v41 = vpop.f32.mrb[80].mxu0 }
 0x418   :  { %v4753_v3 = vpop.f32.mrb[80].mxu1  ;;  %v4690_v4 = vpop.f32.mrb[81].mxu0 }
 0x419   :  { %4249 = vst [vmem:[#allocation7 + $0x38] sm:$0xff] %v4207_v61  ;;  %v4691_v5 = vadd.f32 %v4690_v4, %v4689_v41  ;;  %v4754_v6 = vpop.f32.mrb[81].mxu1  ;;  %v4692_v7 = vpop.f32.mrb[82].mxu0 }
 0x41a   :  { %v4755_v0 = vadd.f32 %v4754_v6, %v4753_v3  ;;  %v4756_v40 = vpop.f32.mrb[82].mxu1  ;;  %v4693_v9 = vpop.f32.mrb[83].mxu0 }
 0x41b   :  { %v4115_v11 = vadd.f32 %v4691_v5, %v7030_v43  ;;  %v4694_v12 = vadd.f32 %v4693_v9, %v4692_v7  ;;  %v4757_v13 = vpop.f32.mrb[83].mxu1 }
 0x41c   :  { %v4758_v14 = vadd.f32 %v4757_v13, %v4756_v40 }
 0x41d   :  { %v4212_v38 = vadd.f32 %v4755_v0, %v4115_v11  ;;  %v4118_v24 = vadd.f32 %v4694_v12, %v7030_v43 }
 0x41f   :  { %4250 = vst [vmem:[#allocation7 + $0x40] sm:$0xff] %v4212_v38  ;;  %v4215_v26 = vadd.f32 %v4758_v14, %v4118_v24  ;;  %v4695_v8 = vpop.f32.mrb[84].mxu0 }
 0x420   :  { %v4759_v10 = vpop.f32.mrb[84].mxu1  ;;  %v4696_v15 = vpop.f32.mrb[85].mxu0 }
 0x421   :  { %4251 = vst [vmem:[#allocation7 + $0x48] sm:$0xff] %v4215_v26  ;;  %v4697_v16 = vadd.f32 %v4696_v15, %v4695_v8  ;;  %v4760_v17 = vpop.f32.mrb[85].mxu1  ;;  %v4698_v18 = vpop.f32.mrb[86].mxu0 }
 0x422   :  { %v4761_v49 = vadd.f32 %v4760_v17, %v4759_v10  ;;  %v4762_v20 = vpop.f32.mrb[86].mxu1  ;;  %v4699_v23 = vpop.f32.mrb[87].mxu0 }
 0x423   :  { %v4123_v50 = vadd.f32 %v4697_v16, %v7030_v43  ;;  %v4700_v25 = vadd.f32 %v4699_v23, %v4698_v18  ;;  %v4763_v52 = vpop.f32.mrb[87].mxu1 }
 0x424   :  { %v4764_v54 = vadd.f32 %v4763_v52, %v4762_v20 }
 0x425   :  { %v4220_v55 = vadd.f32 %v4761_v49, %v4123_v50  ;;  %v4126_v48 = vadd.f32 %v4700_v25, %v7030_v43 }
 0x427   :  { %4252 = vst [vmem:[#allocation7 + $0x50] sm:$0xff] %v4220_v55  ;;  %v4223_v53 = vadd.f32 %v4764_v54, %v4126_v48  ;;  %v4701_v27 = vpop.f32.mrb[88].mxu0 }
 0x428   :  { %v4765_v28 = vpop.f32.mrb[88].mxu1  ;;  %v4702_v29 = vpop.f32.mrb[89].mxu0 }
 0x429   :  { %4253 = vst [vmem:[#allocation7 + $0x58] sm:$0xff] %v4223_v53  ;;  %v4703_v30 = vadd.f32 %v4702_v29, %v4701_v27  ;;  %v4766_v56 = vpop.f32.mrb[89].mxu1  ;;  %v4704_v57 = vpop.f32.mrb[90].mxu0 }
 0x42a   :  { %v4767_v31 = vadd.f32 %v4766_v56, %v4765_v28  ;;  %v4768_v32 = vpop.f32.mrb[90].mxu1  ;;  %v4705_v33 = vpop.f32.mrb[91].mxu0 }
 0x42b   :  { %v4131_v34 = vadd.f32 %v4703_v30, %v7030_v43  ;;  %v4706_v35 = vadd.f32 %v4705_v33, %v4704_v57  ;;  %v4769_v36 = vpop.f32.mrb[91].mxu1 }
 0x42c   :  { %v4770_v37 = vadd.f32 %v4769_v36, %v4768_v32 }
 0x42d   :  { %v4228_v22 = vadd.f32 %v4767_v31, %v4131_v34  ;;  %v4134_v39 = vadd.f32 %v4706_v35, %v7030_v43 }
 0x42f   :  { %4254 = vst [vmem:[#allocation7 + $0x60] sm:$0xff] %v4228_v22  ;;  %v4231_v42 = vadd.f32 %v4770_v37, %v4134_v39  ;;  %v4707_v44 = vpop.f32.mrb[92].mxu0 }
 0x430   :  { %v4771_v45 = vpop.f32.mrb[92].mxu1  ;;  %v4708_v46 = vpop.f32.mrb[93].mxu0 }
 0x431   :  { %4255 = vst [vmem:[#allocation7 + $0x68] sm:$0xff] %v4231_v42  ;;  %v4709_v21 = vadd.f32 %v4708_v46, %v4707_v44  ;;  %v4772_v47 = vpop.f32.mrb[93].mxu1  ;;  %v4710_v51 = vpop.f32.mrb[94].mxu0 }
 0x432   :  { %v4773_v58 = vadd.f32 %v4772_v47, %v4771_v45  ;;  %v4774_v60 = vpop.f32.mrb[94].mxu1  ;;  %v4711_v62 = vpop.f32.mrb[95].mxu0 }
 0x433   :  { %v4139_v59 = vadd.f32 %v4709_v21, %v7030_v43  ;;  %v4712_v63 = vadd.f32 %v4711_v62, %v4710_v51  ;;  %v4775_v19 = vpop.f32.mrb[95].mxu1 }
 0x434   :  { %v4776_v2 = vadd.f32 %v4775_v19, %v4774_v60 }
 0x435   :  { %v4236_v1 = vadd.f32 %v4773_v58, %v4139_v59  ;;  %v4142_v61 = vadd.f32 %v4712_v63, %v7030_v43 }
 0x437   :  { %4256 = vst [vmem:[#allocation7 + $0x70] sm:$0xff] %v4236_v1  ;;  %v4239_v41 = vadd.f32 %v4776_v2, %v4142_v61 }
 0x439   :  { %4257 = vst [vmem:[#allocation7 + $0x78] sm:$0xff] %v4239_v41 }
 0x43a   :  { %5744 = shalt.err (!%p5741_p6)
}
 0x43b   :  { %s5745_s23 = scalar_lea.hbm %s7067_s7, 2048 }
 0x43c   :  { %p5746_p7 = scmp.ne.s32.totalorder %s7067_s7, %s5745_s23  ;;  %p5749_p8 = scmp.lt.u32.totalorder %s5745_s23, %s7067_s7 }
 0x43e   :  { %p5751_p9 = pnand %p5749_p8, %p5746_p7 }
 0x440   :  { %5754 = shalt.err (!%p5751_p9)
}
 0x441   :  { %s5769_s27 = smov 128   ;;  %s5770_s28 = smov 8  }
 0x442   :  { %4269 = dma.vmem_to_hbm [thread:$0]  %s4264_s19, 2048, %s7067_s7, [#allocation4], %s5769_s27, %s5769_s27, %s5770_s28  }
 0x443   :  { %5759 = dma.done.wait [#allocation4], 2048  }
 0x444   :  { %5760 = vsyncadd [#allocation4], 4294965248 }
 0x445   :  { %4273 = vsyncpa [#allocation3], 1 }
 0x446   :  { %4274 = vsyncpa [#allocation6], 1 }
 0x447   :  { %4275 = vsyncpa [#allocation4], 1 }

</bundles_post_ra>
